<compile_context>
chip_gen: v7x
topology: tpu7x:2x2x1
jax: 0.10.0
libtpu: 0.0.40
codegen_flags: <defaults>
</compile_context>

<pallas_src>
import functools

import jax
import jax.numpy as jnp
from jax.experimental import pallas as pl
from jax.experimental.pallas import tpu as pltpu


def _cdiv(a, b):
    return -(-a // b)


def _rup(v, m):
    return _cdiv(v, m) * m


def _patch_embed_kernel(x_ref, w_ref, b_ref, o_ref, *,
                        kernel, stride, out_dim, Wb, th, Tb_p, n_bands):
    """One (batch, band) grid step of the fused overlap-patch embedding.

    x_ref : (1, s*s, C, Ltot)   s x s space-to-depth'ed image, (row, col) of the
                                output grid fused into the last (lane) axis
    w_ref : (k*k, out_dim, C)   one (out_dim, C) weight tile per kernel tap
    b_ref : (out_dim, 1)        bias, f32
    o_ref : (1, out_dim, Tb_p)  output band: th rows x Wb cols (lane padded)
    """
    k, s = kernel, stride
    j = pl.program_id(1) if n_bands > 1 else 0
    row0 = j * th

    # f32 accumulator kept as a value (vregs); bias folded into the init so
    # there is no epilogue add.
    acc = jnp.broadcast_to(b_ref[...], (out_dim, Tb_p)).astype(jnp.float32)

    # k*k per-tap matmuls; each tap reads ONE contiguous (C, Tb_p) lane window
    # and pushes a short-K matmul to the (otherwise idle) MXU.
    for ki in range(k):
        i, di = ki % s, ki // s
        for kj in range(k):
            jj, dj = kj % s, kj // s
            t = ki * k + kj
            start = (row0 + di) * Wb + dj           # static when n_bands == 1
            slab = x_ref[0, i * s + jj, :, pl.ds(start, Tb_p)]      # (C, Tb_p)
            acc = acc + jnp.dot(w_ref[t], slab,
                                preferred_element_type=jnp.float32)

    o_ref[0, :, :] = acc.astype(o_ref.dtype)


def _unfold_nchw_ref(x, k, s, p):
    """Pure-JAX nn.Unfold reference (PyTorch channel order: c-major, ki, kj)."""
    B, C, H, W = x.shape
    out_h = (H + 2 * p - k) // s + 1
    out_w = (W + 2 * p - k) // s + 1
    xp = jnp.pad(x, ((0, 0), (0, 0), (p, p), (p, p)))
    cols = [xp[:, :, i:i + (out_h - 1) * s + 1:s, j:j + (out_w - 1) * s + 1:s]
            for i in range(k) for j in range(k)]
    patches = jnp.stack(cols, axis=2).reshape(B, C * k * k, out_h * out_w)
    return patches, out_h, out_w


@functools.partial(jax.jit,
                   static_argnames=("kernel", "stride", "padding", "compute_dtype"))
def overlap_patch_embedding(x, weight, bias, *, kernel, stride, padding,
                            compute_dtype=None):
    """Forward pass of OverlapPatchEmbedding.

    x:      (B, C, H, W)                    NCHW, like the PyTorch module
    weight: (out_dim, C*kernel**2, 1, 1)    Conv2d(C*k*k, out_dim, 1) weight
    bias:   (out_dim,)
    compute_dtype: optional MXU operand dtype (e.g. jnp.bfloat16 on v6e/v7x);
                   accumulation and bias stay f32.  Default f32 (v5e-friendly).
    returns (B, out_dim, out_h, out_w)
    """
    B, C, H, W = x.shape
    k, s, p = kernel, stride, padding
    out_dim = weight.shape[0]

    out_h = (H + 2 * p - k) // s + 1
    out_w = (W + 2 * p - k) // s + 1
    dmax = (k - 1) // s                      # max per-tap (row, col) block offset
    Wb = out_w + dmax                        # fused-row width incl. tap slack

    cdt = jnp.dtype(compute_dtype) if compute_dtype is not None else x.dtype
    odt = x.dtype

    # ---------------- band sizing (accumulator-vreg + VMEM budget) -----------
    isz, osz = jnp.dtype(cdt).itemsize, jnp.dtype(odt).itemsize
    g = 8 * max(1, 4 // isz)                 # sublane packing granule (8 f32 / 16 bf16)

    def sizing(th):
        th = max(1, min(th, out_h))
        nb = _cdiv(out_h, th)
        if nb == 1:
            th = out_h
        tb = th * Wb
        tb_p = tb if nb == 1 else _rup(tb, 128)        # lane-aligned output block
        hrows = nb * th + dmax                         # padded output rows + slack
        ltot = hrows * Wb + dmax + (tb_p - tb)         # fused axis incl. overrun pad
        est = 2 * (s * s * _rup(C, g) * _rup(ltot, 128) * isz       # x block (2 bufs)
                   + k * k * _rup(out_dim, g) * 128 * isz           # weight
                   + _rup(out_dim, 8) * 128 * 4                     # bias
                   + _rup(out_dim, 8) * _rup(tb_p, 128) * osz)      # out block
        return th, nb, tb, tb_p, hrows, ltot, est

    acc_vregs = 24                                     # accumulator budget (of 64 vregs)
    lane_tiles = max(1, acc_vregs // _cdiv(out_dim, 8))
    th, n_bands, Tb, Tb_p, Hrows, Ltot, est = sizing(max(1, (lane_tiles * 128) // Wb))
    if B * n_bands < 2 and out_h >= 2:                 # keep both v7x TCs busy
        th, n_bands, Tb, Tb_p, Hrows, Ltot, est = sizing(_cdiv(out_h, 2))
    while 2 * est > 56 * 2 ** 20 and th > 1:           # fit v7x's 64 MiB VMEM
        th, n_bands, Tb, Tb_p, Hrows, Ltot, est = sizing(th // 2)
    vmem_limit = int(min(96 * 2 ** 20, max(32 * 2 ** 20, 2 * est)))

    # ---------------- light wrapper-side pre-layout: O(|x|) only -------------
    # Zero-pad (conv padding + band/tap slack), s x s space-to-depth, fuse the
    # (output-row, output-col) axes:  x_flat[b, i*s+jj, c, oh*Wb + wb]
    #   == x_padded[b, c, oh*s + i, wb*s + jj]
    Hp2, Wp2 = Hrows * s, Wb * s
    pad_b = max(0, Hp2 - H - p)
    pad_r = max(0, Wp2 - W - p)
    xp = jnp.pad(x, ((0, 0), (0, 0), (p, pad_b), (p, pad_r)))[:, :, :Hp2, :Wp2]
    x_flat = (xp.reshape(B, C, Hrows, s, Wb, s)
                .transpose(0, 3, 5, 1, 2, 4)
                .reshape(B, s * s, C, Hrows * Wb))
    tail = Ltot - Hrows * Wb                           # window-overrun slack lanes
    if tail:
        x_flat = jnp.pad(x_flat, ((0, 0), (0, 0), (0, 0), (0, tail)))
    x_flat = x_flat.astype(cdt)

    # Per-tap (out_dim, C) weight tiles, preserving PyTorch's Unfold channel
    # order (flat index c*k*k + ki*k + kj).
    w3 = weight.reshape(out_dim, C, k * k).transpose(2, 0, 1).astype(cdt)
    b2 = bias.reshape(out_dim, 1).astype(jnp.float32)

    kern = functools.partial(_patch_embed_kernel, kernel=k, stride=s,
                             out_dim=out_dim, Wb=Wb, th=th, Tb_p=Tb_p,
                             n_bands=n_bands)

    y = pl.pallas_call(
        kern,
        out_shape=jax.ShapeDtypeStruct((B, out_dim, n_bands * Tb_p), odt),
        grid=(B, n_bands),
        in_specs=[
            # per-batch image slab, resident across bands (index_map ignores j)
            pl.BlockSpec((1, s * s, C, Ltot), lambda b, j: (b, 0, 0, 0)),
            pl.BlockSpec((k * k, out_dim, C), lambda b, j: (0, 0, 0)),   # weight
            pl.BlockSpec((out_dim, 1), lambda b, j: (0, 0)),             # bias
        ],
        out_specs=pl.BlockSpec((1, out_dim, Tb_p), lambda b, j: (b, 0, j)),
        compiler_params=pltpu.CompilerParams(
            dimension_semantics=("parallel", "parallel"),   # megacore split
            vmem_limit_bytes=vmem_limit,
        ),
    )(x_flat, w3, b2)

    # Drop the per-band lane padding and the slack columns / padded rows.
    # Reshapes are metadata; the slices are tiny and normally fuse into the
    # consumer of the embedding.
    y = y.reshape(B, out_dim, n_bands, Tb_p)[:, :, :, :Tb]
    y = y.reshape(B, out_dim, n_bands * th, Wb)[:, :, :out_h, :out_w]
    return y


if __name__ == "__main__":
    # Module hyperparameters (typical SegFormer stage-1 config, small shapes).
    kernel, stride, padding = 7, 4, 3
    in_dim, out_dim = 4, 32
    B, H, W = 2, 16, 16

    key = jax.random.PRNGKey(0)
    kx, kw, kb = jax.random.split(key, 3)

    x = jax.random.normal(kx, (B, in_dim, H, W), dtype=jnp.float32)
    fan_in = in_dim * kernel ** 2
    weight = jax.random.normal(kw, (out_dim, fan_in, 1, 1), jnp.float32) / jnp.sqrt(fan_in)
    bias = jax.random.normal(kb, (out_dim,), jnp.float32) * 0.01

    out = overlap_patch_embedding(
        x, weight, bias, kernel=kernel, stride=stride, padding=padding)
    out = jax.block_until_ready(out)

    # Pure-JAX reference: nn.Unfold (im2col, PyTorch channel order) + 1x1 conv.
    patches, oh, ow = _unfold_nchw_ref(x, kernel, stride, padding)   # (B, K, L)
    wmat = weight.reshape(out_dim, fan_in)
    ref = jnp.einsum("dk,bkl->bdl", wmat, patches,
                     precision=jax.lax.Precision.HIGHEST) + bias[None, :, None]
    ref = ref.reshape(B, out_dim, oh, ow)

    assert out.shape == (B, out_dim, H // stride, W // stride), out.shape
    err = float(jnp.max(jnp.abs(out - ref)))
    assert err < 1e-3, err

    # bf16 fast path (v6e/v7x): bf16 MXU operands, f32 accumulation + epilogue.
    out_bf16 = overlap_patch_embedding(
        x, weight, bias, kernel=kernel, stride=stride, padding=padding,
        compute_dtype=jnp.bfloat16)
    out_bf16 = jax.block_until_ready(out_bf16)
    assert float(jnp.max(jnp.abs(out_bf16 - ref))) < 5e-2

    print("KERNEL_OK")
</pallas_src>

<mosaic_0001>
module attributes {stable_mosaic.version = 11 : i64} {
  func.func @_patch_embed_kernel(%arg0: i32, %arg1: i32, %arg2: memref<1x16x4x26xf32, #tpu.memory_space<vmem>>, %arg3: memref<49x32x4xf32, #tpu.memory_space<vmem>>, %arg4: memref<32x1xf32, #tpu.memory_space<vmem>>, %arg5: memref<1x32x20xf32, #tpu.memory_space<vmem>>) attributes {dimension_semantics = [#tpu.dimension_semantics<parallel>, #tpu.dimension_semantics<parallel>], iteration_bounds = array<i64: 2, 1>, scalar_prefetch = 0 : i64, scratch_operands = 0 : i64, tpu.core_type = #tpu.core_type<tc>, window_params = [{transform_indices = @transform_0, window_bounds = array<i64: 1, 16, 4, 26>}, {pipeline_mode = #tpu.pipeline_mode<synchronous>, transform_indices = @transform_1, window_bounds = array<i64: 49, 32, 4>}, {pipeline_mode = #tpu.pipeline_mode<synchronous>, transform_indices = @transform_2, window_bounds = array<i64: 32, 1>}, {transform_indices = @transform_3, window_bounds = array<i64: 1, 32, 20>}]} {
    %c0 = arith.constant 0 : index
    %c0_0 = arith.constant 0 : index
    %0 = vector.load %arg4[%c0, %c0_0] : memref<32x1xf32, #tpu.memory_space<vmem>>, vector<32x1xf32>
    %1 = vector.shape_cast %0 : vector<32x1xf32> to vector<32x1xf32>
    %2 = vector.broadcast %1 : vector<32x1xf32> to vector<32x20xf32>
    %c0_1 = arith.constant 0 : index
    %c0_2 = arith.constant 0 : index
    %c0_3 = arith.constant 0 : index
    %c0_4 = arith.constant 0 : index
    %3 = vector.load %arg2[%c0_1, %c0_2, %c0_3, %c0_4] : memref<1x16x4x26xf32, #tpu.memory_space<vmem>>, vector<1x1x4x20xf32>
    %4 = vector.shape_cast %3 : vector<1x1x4x20xf32> to vector<4x20xf32>
    %c0_5 = arith.constant 0 : index
    %c0_6 = arith.constant 0 : index
    %c0_7 = arith.constant 0 : index
    %5 = vector.load %arg3[%c0_5, %c0_6, %c0_7] : memref<49x32x4xf32, #tpu.memory_space<vmem>>, vector<1x32x4xf32>
    %6 = vector.shape_cast %5 : vector<1x32x4xf32> to vector<32x4xf32>
    %cst = arith.constant dense<0.000000e+00> : vector<32x20xf32>
    %7 = tpu.matmul %6, %4, %cst {dimension_numbers = #tpu.dot_dimension_numbers<[1], [0], [0], [1], [0, 0, 1, 1], [], []>} : vector<32x4xf32>, vector<4x20xf32>, vector<32x20xf32> -> vector<32x20xf32>
    %8 = arith.addf %2, %7 : vector<32x20xf32>
    %c0_8 = arith.constant 0 : index
    %c1 = arith.constant 1 : index
    %c0_9 = arith.constant 0 : index
    %c0_10 = arith.constant 0 : index
    %9 = vector.load %arg2[%c0_8, %c1, %c0_9, %c0_10] : memref<1x16x4x26xf32, #tpu.memory_space<vmem>>, vector<1x1x4x20xf32>
    %10 = vector.shape_cast %9 : vector<1x1x4x20xf32> to vector<4x20xf32>
    %c1_11 = arith.constant 1 : index
    %c0_12 = arith.constant 0 : index
    %c0_13 = arith.constant 0 : index
    %11 = vector.load %arg3[%c1_11, %c0_12, %c0_13] : memref<49x32x4xf32, #tpu.memory_space<vmem>>, vector<1x32x4xf32>
    %12 = vector.shape_cast %11 : vector<1x32x4xf32> to vector<32x4xf32>
    %cst_14 = arith.constant dense<0.000000e+00> : vector<32x20xf32>
    %13 = tpu.matmul %12, %10, %cst_14 {dimension_numbers = #tpu.dot_dimension_numbers<[1], [0], [0], [1], [0, 0, 1, 1], [], []>} : vector<32x4xf32>, vector<4x20xf32>, vector<32x20xf32> -> vector<32x20xf32>
    %14 = arith.addf %8, %13 : vector<32x20xf32>
    %c0_15 = arith.constant 0 : index
    %c2 = arith.constant 2 : index
    %c0_16 = arith.constant 0 : index
    %c0_17 = arith.constant 0 : index
    %15 = vector.load %arg2[%c0_15, %c2, %c0_16, %c0_17] : memref<1x16x4x26xf32, #tpu.memory_space<vmem>>, vector<1x1x4x20xf32>
    %16 = vector.shape_cast %15 : vector<1x1x4x20xf32> to vector<4x20xf32>
    %c2_18 = arith.constant 2 : index
    %c0_19 = arith.constant 0 : index
    %c0_20 = arith.constant 0 : index
    %17 = vector.load %arg3[%c2_18, %c0_19, %c0_20] : memref<49x32x4xf32, #tpu.memory_space<vmem>>, vector<1x32x4xf32>
    %18 = vector.shape_cast %17 : vector<1x32x4xf32> to vector<32x4xf32>
    %cst_21 = arith.constant dense<0.000000e+00> : vector<32x20xf32>
    %19 = tpu.matmul %18, %16, %cst_21 {dimension_numbers = #tpu.dot_dimension_numbers<[1], [0], [0], [1], [0, 0, 1, 1], [], []>} : vector<32x4xf32>, vector<4x20xf32>, vector<32x20xf32> -> vector<32x20xf32>
    %20 = arith.addf %14, %19 : vector<32x20xf32>
    %c0_22 = arith.constant 0 : index
    %c3 = arith.constant 3 : index
    %c0_23 = arith.constant 0 : index
    %c0_24 = arith.constant 0 : index
    %21 = vector.load %arg2[%c0_22, %c3, %c0_23, %c0_24] : memref<1x16x4x26xf32, #tpu.memory_space<vmem>>, vector<1x1x4x20xf32>
    %22 = vector.shape_cast %21 : vector<1x1x4x20xf32> to vector<4x20xf32>
    %c3_25 = arith.constant 3 : index
    %c0_26 = arith.constant 0 : index
    %c0_27 = arith.constant 0 : index
    %23 = vector.load %arg3[%c3_25, %c0_26, %c0_27] : memref<49x32x4xf32, #tpu.memory_space<vmem>>, vector<1x32x4xf32>
    %24 = vector.shape_cast %23 : vector<1x32x4xf32> to vector<32x4xf32>
    %cst_28 = arith.constant dense<0.000000e+00> : vector<32x20xf32>
    %25 = tpu.matmul %24, %22, %cst_28 {dimension_numbers = #tpu.dot_dimension_numbers<[1], [0], [0], [1], [0, 0, 1, 1], [], []>} : vector<32x4xf32>, vector<4x20xf32>, vector<32x20xf32> -> vector<32x20xf32>
    %26 = arith.addf %20, %25 : vector<32x20xf32>
    %c0_29 = arith.constant 0 : index
    %c0_30 = arith.constant 0 : index
    %c0_31 = arith.constant 0 : index
    %c1_32 = arith.constant 1 : index
    %27 = vector.load %arg2[%c0_29, %c0_30, %c0_31, %c1_32] : memref<1x16x4x26xf32, #tpu.memory_space<vmem>>, vector<1x1x4x20xf32>
    %28 = vector.shape_cast %27 : vector<1x1x4x20xf32> to vector<4x20xf32>
    %c4 = arith.constant 4 : index
    %c0_33 = arith.constant 0 : index
    %c0_34 = arith.constant 0 : index
    %29 = vector.load %arg3[%c4, %c0_33, %c0_34] : memref<49x32x4xf32, #tpu.memory_space<vmem>>, vector<1x32x4xf32>
    %30 = vector.shape_cast %29 : vector<1x32x4xf32> to vector<32x4xf32>
    %cst_35 = arith.constant dense<0.000000e+00> : vector<32x20xf32>
    %31 = tpu.matmul %30, %28, %cst_35 {dimension_numbers = #tpu.dot_dimension_numbers<[1], [0], [0], [1], [0, 0, 1, 1], [], []>} : vector<32x4xf32>, vector<4x20xf32>, vector<32x20xf32> -> vector<32x20xf32>
    %32 = arith.addf %26, %31 : vector<32x20xf32>
    %c0_36 = arith.constant 0 : index
    %c1_37 = arith.constant 1 : index
    %c0_38 = arith.constant 0 : index
    %c1_39 = arith.constant 1 : index
    %33 = vector.load %arg2[%c0_36, %c1_37, %c0_38, %c1_39] : memref<1x16x4x26xf32, #tpu.memory_space<vmem>>, vector<1x1x4x20xf32>
    %34 = vector.shape_cast %33 : vector<1x1x4x20xf32> to vector<4x20xf32>
    %c5 = arith.constant 5 : index
    %c0_40 = arith.constant 0 : index
    %c0_41 = arith.constant 0 : index
    %35 = vector.load %arg3[%c5, %c0_40, %c0_41] : memref<49x32x4xf32, #tpu.memory_space<vmem>>, vector<1x32x4xf32>
    %36 = vector.shape_cast %35 : vector<1x32x4xf32> to vector<32x4xf32>
    %cst_42 = arith.constant dense<0.000000e+00> : vector<32x20xf32>
    %37 = tpu.matmul %36, %34, %cst_42 {dimension_numbers = #tpu.dot_dimension_numbers<[1], [0], [0], [1], [0, 0, 1, 1], [], []>} : vector<32x4xf32>, vector<4x20xf32>, vector<32x20xf32> -> vector<32x20xf32>
    %38 = arith.addf %32, %37 : vector<32x20xf32>
    %c0_43 = arith.constant 0 : index
    %c2_44 = arith.constant 2 : index
    %c0_45 = arith.constant 0 : index
    %c1_46 = arith.constant 1 : index
    %39 = vector.load %arg2[%c0_43, %c2_44, %c0_45, %c1_46] : memref<1x16x4x26xf32, #tpu.memory_space<vmem>>, vector<1x1x4x20xf32>
    %40 = vector.shape_cast %39 : vector<1x1x4x20xf32> to vector<4x20xf32>
    %c6 = arith.constant 6 : index
    %c0_47 = arith.constant 0 : index
    %c0_48 = arith.constant 0 : index
    %41 = vector.load %arg3[%c6, %c0_47, %c0_48] : memref<49x32x4xf32, #tpu.memory_space<vmem>>, vector<1x32x4xf32>
    %42 = vector.shape_cast %41 : vector<1x32x4xf32> to vector<32x4xf32>
    %cst_49 = arith.constant dense<0.000000e+00> : vector<32x20xf32>
    %43 = tpu.matmul %42, %40, %cst_49 {dimension_numbers = #tpu.dot_dimension_numbers<[1], [0], [0], [1], [0, 0, 1, 1], [], []>} : vector<32x4xf32>, vector<4x20xf32>, vector<32x20xf32> -> vector<32x20xf32>
    %44 = arith.addf %38, %43 : vector<32x20xf32>
    %c0_50 = arith.constant 0 : index
    %c4_51 = arith.constant 4 : index
    %c0_52 = arith.constant 0 : index
    %c0_53 = arith.constant 0 : index
    %45 = vector.load %arg2[%c0_50, %c4_51, %c0_52, %c0_53] : memref<1x16x4x26xf32, #tpu.memory_space<vmem>>, vector<1x1x4x20xf32>
    %46 = vector.shape_cast %45 : vector<1x1x4x20xf32> to vector<4x20xf32>
    %c7 = arith.constant 7 : index
    %c0_54 = arith.constant 0 : index
    %c0_55 = arith.constant 0 : index
    %47 = vector.load %arg3[%c7, %c0_54, %c0_55] : memref<49x32x4xf32, #tpu.memory_space<vmem>>, vector<1x32x4xf32>
    %48 = vector.shape_cast %47 : vector<1x32x4xf32> to vector<32x4xf32>
    %cst_56 = arith.constant dense<0.000000e+00> : vector<32x20xf32>
    %49 = tpu.matmul %48, %46, %cst_56 {dimension_numbers = #tpu.dot_dimension_numbers<[1], [0], [0], [1], [0, 0, 1, 1], [], []>} : vector<32x4xf32>, vector<4x20xf32>, vector<32x20xf32> -> vector<32x20xf32>
    %50 = arith.addf %44, %49 : vector<32x20xf32>
    %c0_57 = arith.constant 0 : index
    %c5_58 = arith.constant 5 : index
    %c0_59 = arith.constant 0 : index
    %c0_60 = arith.constant 0 : index
    %51 = vector.load %arg2[%c0_57, %c5_58, %c0_59, %c0_60] : memref<1x16x4x26xf32, #tpu.memory_space<vmem>>, vector<1x1x4x20xf32>
    %52 = vector.shape_cast %51 : vector<1x1x4x20xf32> to vector<4x20xf32>
    %c8 = arith.constant 8 : index
    %c0_61 = arith.constant 0 : index
    %c0_62 = arith.constant 0 : index
    %53 = vector.load %arg3[%c8, %c0_61, %c0_62] : memref<49x32x4xf32, #tpu.memory_space<vmem>>, vector<1x32x4xf32>
    %54 = vector.shape_cast %53 : vector<1x32x4xf32> to vector<32x4xf32>
    %cst_63 = arith.constant dense<0.000000e+00> : vector<32x20xf32>
    %55 = tpu.matmul %54, %52, %cst_63 {dimension_numbers = #tpu.dot_dimension_numbers<[1], [0], [0], [1], [0, 0, 1, 1], [], []>} : vector<32x4xf32>, vector<4x20xf32>, vector<32x20xf32> -> vector<32x20xf32>
    %56 = arith.addf %50, %55 : vector<32x20xf32>
    %c0_64 = arith.constant 0 : index
    %c6_65 = arith.constant 6 : index
    %c0_66 = arith.constant 0 : index
    %c0_67 = arith.constant 0 : index
    %57 = vector.load %arg2[%c0_64, %c6_65, %c0_66, %c0_67] : memref<1x16x4x26xf32, #tpu.memory_space<vmem>>, vector<1x1x4x20xf32>
    %58 = vector.shape_cast %57 : vector<1x1x4x20xf32> to vector<4x20xf32>
    %c9 = arith.constant 9 : index
    %c0_68 = arith.constant 0 : index
    %c0_69 = arith.constant 0 : index
    %59 = vector.load %arg3[%c9, %c0_68, %c0_69] : memref<49x32x4xf32, #tpu.memory_space<vmem>>, vector<1x32x4xf32>
    %60 = vector.shape_cast %59 : vector<1x32x4xf32> to vector<32x4xf32>
    %cst_70 = arith.constant dense<0.000000e+00> : vector<32x20xf32>
    %61 = tpu.matmul %60, %58, %cst_70 {dimension_numbers = #tpu.dot_dimension_numbers<[1], [0], [0], [1], [0, 0, 1, 1], [], []>} : vector<32x4xf32>, vector<4x20xf32>, vector<32x20xf32> -> vector<32x20xf32>
    %62 = arith.addf %56, %61 : vector<32x20xf32>
    %c0_71 = arith.constant 0 : index
    %c7_72 = arith.constant 7 : index
    %c0_73 = arith.constant 0 : index
    %c0_74 = arith.constant 0 : index
    %63 = vector.load %arg2[%c0_71, %c7_72, %c0_73, %c0_74] : memref<1x16x4x26xf32, #tpu.memory_space<vmem>>, vector<1x1x4x20xf32>
    %64 = vector.shape_cast %63 : vector<1x1x4x20xf32> to vector<4x20xf32>
    %c10 = arith.constant 10 : index
    %c0_75 = arith.constant 0 : index
    %c0_76 = arith.constant 0 : index
    %65 = vector.load %arg3[%c10, %c0_75, %c0_76] : memref<49x32x4xf32, #tpu.memory_space<vmem>>, vector<1x32x4xf32>
    %66 = vector.shape_cast %65 : vector<1x32x4xf32> to vector<32x4xf32>
    %cst_77 = arith.constant dense<0.000000e+00> : vector<32x20xf32>
    %67 = tpu.matmul %66, %64, %cst_77 {dimension_numbers = #tpu.dot_dimension_numbers<[1], [0], [0], [1], [0, 0, 1, 1], [], []>} : vector<32x4xf32>, vector<4x20xf32>, vector<32x20xf32> -> vector<32x20xf32>
    %68 = arith.addf %62, %67 : vector<32x20xf32>
    %c0_78 = arith.constant 0 : index
    %c4_79 = arith.constant 4 : index
    %c0_80 = arith.constant 0 : index
    %c1_81 = arith.constant 1 : index
    %69 = vector.load %arg2[%c0_78, %c4_79, %c0_80, %c1_81] : memref<1x16x4x26xf32, #tpu.memory_space<vmem>>, vector<1x1x4x20xf32>
    %70 = vector.shape_cast %69 : vector<1x1x4x20xf32> to vector<4x20xf32>
    %c11 = arith.constant 11 : index
    %c0_82 = arith.constant 0 : index
    %c0_83 = arith.constant 0 : index
    %71 = vector.load %arg3[%c11, %c0_82, %c0_83] : memref<49x32x4xf32, #tpu.memory_space<vmem>>, vector<1x32x4xf32>
    %72 = vector.shape_cast %71 : vector<1x32x4xf32> to vector<32x4xf32>
    %cst_84 = arith.constant dense<0.000000e+00> : vector<32x20xf32>
    %73 = tpu.matmul %72, %70, %cst_84 {dimension_numbers = #tpu.dot_dimension_numbers<[1], [0], [0], [1], [0, 0, 1, 1], [], []>} : vector<32x4xf32>, vector<4x20xf32>, vector<32x20xf32> -> vector<32x20xf32>
    %74 = arith.addf %68, %73 : vector<32x20xf32>
    %c0_85 = arith.constant 0 : index
    %c5_86 = arith.constant 5 : index
    %c0_87 = arith.constant 0 : index
    %c1_88 = arith.constant 1 : index
    %75 = vector.load %arg2[%c0_85, %c5_86, %c0_87, %c1_88] : memref<1x16x4x26xf32, #tpu.memory_space<vmem>>, vector<1x1x4x20xf32>
    %76 = vector.shape_cast %75 : vector<1x1x4x20xf32> to vector<4x20xf32>
    %c12 = arith.constant 12 : index
    %c0_89 = arith.constant 0 : index
    %c0_90 = arith.constant 0 : index
    %77 = vector.load %arg3[%c12, %c0_89, %c0_90] : memref<49x32x4xf32, #tpu.memory_space<vmem>>, vector<1x32x4xf32>
    %78 = vector.shape_cast %77 : vector<1x32x4xf32> to vector<32x4xf32>
    %cst_91 = arith.constant dense<0.000000e+00> : vector<32x20xf32>
    %79 = tpu.matmul %78, %76, %cst_91 {dimension_numbers = #tpu.dot_dimension_numbers<[1], [0], [0], [1], [0, 0, 1, 1], [], []>} : vector<32x4xf32>, vector<4x20xf32>, vector<32x20xf32> -> vector<32x20xf32>
    %80 = arith.addf %74, %79 : vector<32x20xf32>
    %c0_92 = arith.constant 0 : index
    %c6_93 = arith.constant 6 : index
    %c0_94 = arith.constant 0 : index
    %c1_95 = arith.constant 1 : index
    %81 = vector.load %arg2[%c0_92, %c6_93, %c0_94, %c1_95] : memref<1x16x4x26xf32, #tpu.memory_space<vmem>>, vector<1x1x4x20xf32>
    %82 = vector.shape_cast %81 : vector<1x1x4x20xf32> to vector<4x20xf32>
    %c13 = arith.constant 13 : index
    %c0_96 = arith.constant 0 : index
    %c0_97 = arith.constant 0 : index
    %83 = vector.load %arg3[%c13, %c0_96, %c0_97] : memref<49x32x4xf32, #tpu.memory_space<vmem>>, vector<1x32x4xf32>
    %84 = vector.shape_cast %83 : vector<1x32x4xf32> to vector<32x4xf32>
    %cst_98 = arith.constant dense<0.000000e+00> : vector<32x20xf32>
    %85 = tpu.matmul %84, %82, %cst_98 {dimension_numbers = #tpu.dot_dimension_numbers<[1], [0], [0], [1], [0, 0, 1, 1], [], []>} : vector<32x4xf32>, vector<4x20xf32>, vector<32x20xf32> -> vector<32x20xf32>
    %86 = arith.addf %80, %85 : vector<32x20xf32>
    %c0_99 = arith.constant 0 : index
    %c8_100 = arith.constant 8 : index
    %c0_101 = arith.constant 0 : index
    %c0_102 = arith.constant 0 : index
    %87 = vector.load %arg2[%c0_99, %c8_100, %c0_101, %c0_102] : memref<1x16x4x26xf32, #tpu.memory_space<vmem>>, vector<1x1x4x20xf32>
    %88 = vector.shape_cast %87 : vector<1x1x4x20xf32> to vector<4x20xf32>
    %c14 = arith.constant 14 : index
    %c0_103 = arith.constant 0 : index
    %c0_104 = arith.constant 0 : index
    %89 = vector.load %arg3[%c14, %c0_103, %c0_104] : memref<49x32x4xf32, #tpu.memory_space<vmem>>, vector<1x32x4xf32>
    %90 = vector.shape_cast %89 : vector<1x32x4xf32> to vector<32x4xf32>
    %cst_105 = arith.constant dense<0.000000e+00> : vector<32x20xf32>
    %91 = tpu.matmul %90, %88, %cst_105 {dimension_numbers = #tpu.dot_dimension_numbers<[1], [0], [0], [1], [0, 0, 1, 1], [], []>} : vector<32x4xf32>, vector<4x20xf32>, vector<32x20xf32> -> vector<32x20xf32>
    %92 = arith.addf %86, %91 : vector<32x20xf32>
    %c0_106 = arith.constant 0 : index
    %c9_107 = arith.constant 9 : index
    %c0_108 = arith.constant 0 : index
    %c0_109 = arith.constant 0 : index
    %93 = vector.load %arg2[%c0_106, %c9_107, %c0_108, %c0_109] : memref<1x16x4x26xf32, #tpu.memory_space<vmem>>, vector<1x1x4x20xf32>
    %94 = vector.shape_cast %93 : vector<1x1x4x20xf32> to vector<4x20xf32>
    %c15 = arith.constant 15 : index
    %c0_110 = arith.constant 0 : index
    %c0_111 = arith.constant 0 : index
    %95 = vector.load %arg3[%c15, %c0_110, %c0_111] : memref<49x32x4xf32, #tpu.memory_space<vmem>>, vector<1x32x4xf32>
    %96 = vector.shape_cast %95 : vector<1x32x4xf32> to vector<32x4xf32>
    %cst_112 = arith.constant dense<0.000000e+00> : vector<32x20xf32>
    %97 = tpu.matmul %96, %94, %cst_112 {dimension_numbers = #tpu.dot_dimension_numbers<[1], [0], [0], [1], [0, 0, 1, 1], [], []>} : vector<32x4xf32>, vector<4x20xf32>, vector<32x20xf32> -> vector<32x20xf32>
    %98 = arith.addf %92, %97 : vector<32x20xf32>
    %c0_113 = arith.constant 0 : index
    %c10_114 = arith.constant 10 : index
    %c0_115 = arith.constant 0 : index
    %c0_116 = arith.constant 0 : index
    %99 = vector.load %arg2[%c0_113, %c10_114, %c0_115, %c0_116] : memref<1x16x4x26xf32, #tpu.memory_space<vmem>>, vector<1x1x4x20xf32>
    %100 = vector.shape_cast %99 : vector<1x1x4x20xf32> to vector<4x20xf32>
    %c16 = arith.constant 16 : index
    %c0_117 = arith.constant 0 : index
    %c0_118 = arith.constant 0 : index
    %101 = vector.load %arg3[%c16, %c0_117, %c0_118] : memref<49x32x4xf32, #tpu.memory_space<vmem>>, vector<1x32x4xf32>
    %102 = vector.shape_cast %101 : vector<1x32x4xf32> to vector<32x4xf32>
    %cst_119 = arith.constant dense<0.000000e+00> : vector<32x20xf32>
    %103 = tpu.matmul %102, %100, %cst_119 {dimension_numbers = #tpu.dot_dimension_numbers<[1], [0], [0], [1], [0, 0, 1, 1], [], []>} : vector<32x4xf32>, vector<4x20xf32>, vector<32x20xf32> -> vector<32x20xf32>
    %104 = arith.addf %98, %103 : vector<32x20xf32>
    %c0_120 = arith.constant 0 : index
    %c11_121 = arith.constant 11 : index
    %c0_122 = arith.constant 0 : index
    %c0_123 = arith.constant 0 : index
    %105 = vector.load %arg2[%c0_120, %c11_121, %c0_122, %c0_123] : memref<1x16x4x26xf32, #tpu.memory_space<vmem>>, vector<1x1x4x20xf32>
    %106 = vector.shape_cast %105 : vector<1x1x4x20xf32> to vector<4x20xf32>
    %c17 = arith.constant 17 : index
    %c0_124 = arith.constant 0 : index
    %c0_125 = arith.constant 0 : index
    %107 = vector.load %arg3[%c17, %c0_124, %c0_125] : memref<49x32x4xf32, #tpu.memory_space<vmem>>, vector<1x32x4xf32>
    %108 = vector.shape_cast %107 : vector<1x32x4xf32> to vector<32x4xf32>
    %cst_126 = arith.constant dense<0.000000e+00> : vector<32x20xf32>
    %109 = tpu.matmul %108, %106, %cst_126 {dimension_numbers = #tpu.dot_dimension_numbers<[1], [0], [0], [1], [0, 0, 1, 1], [], []>} : vector<32x4xf32>, vector<4x20xf32>, vector<32x20xf32> -> vector<32x20xf32>
    %110 = arith.addf %104, %109 : vector<32x20xf32>
    %c0_127 = arith.constant 0 : index
    %c8_128 = arith.constant 8 : index
    %c0_129 = arith.constant 0 : index
    %c1_130 = arith.constant 1 : index
    %111 = vector.load %arg2[%c0_127, %c8_128, %c0_129, %c1_130] : memref<1x16x4x26xf32, #tpu.memory_space<vmem>>, vector<1x1x4x20xf32>
    %112 = vector.shape_cast %111 : vector<1x1x4x20xf32> to vector<4x20xf32>
    %c18 = arith.constant 18 : index
    %c0_131 = arith.constant 0 : index
    %c0_132 = arith.constant 0 : index
    %113 = vector.load %arg3[%c18, %c0_131, %c0_132] : memref<49x32x4xf32, #tpu.memory_space<vmem>>, vector<1x32x4xf32>
    %114 = vector.shape_cast %113 : vector<1x32x4xf32> to vector<32x4xf32>
    %cst_133 = arith.constant dense<0.000000e+00> : vector<32x20xf32>
    %115 = tpu.matmul %114, %112, %cst_133 {dimension_numbers = #tpu.dot_dimension_numbers<[1], [0], [0], [1], [0, 0, 1, 1], [], []>} : vector<32x4xf32>, vector<4x20xf32>, vector<32x20xf32> -> vector<32x20xf32>
    %116 = arith.addf %110, %115 : vector<32x20xf32>
    %c0_134 = arith.constant 0 : index
    %c9_135 = arith.constant 9 : index
    %c0_136 = arith.constant 0 : index
    %c1_137 = arith.constant 1 : index
    %117 = vector.load %arg2[%c0_134, %c9_135, %c0_136, %c1_137] : memref<1x16x4x26xf32, #tpu.memory_space<vmem>>, vector<1x1x4x20xf32>
    %118 = vector.shape_cast %117 : vector<1x1x4x20xf32> to vector<4x20xf32>
    %c19 = arith.constant 19 : index
    %c0_138 = arith.constant 0 : index
    %c0_139 = arith.constant 0 : index
    %119 = vector.load %arg3[%c19, %c0_138, %c0_139] : memref<49x32x4xf32, #tpu.memory_space<vmem>>, vector<1x32x4xf32>
    %120 = vector.shape_cast %119 : vector<1x32x4xf32> to vector<32x4xf32>
    %cst_140 = arith.constant dense<0.000000e+00> : vector<32x20xf32>
    %121 = tpu.matmul %120, %118, %cst_140 {dimension_numbers = #tpu.dot_dimension_numbers<[1], [0], [0], [1], [0, 0, 1, 1], [], []>} : vector<32x4xf32>, vector<4x20xf32>, vector<32x20xf32> -> vector<32x20xf32>
    %122 = arith.addf %116, %121 : vector<32x20xf32>
    %c0_141 = arith.constant 0 : index
    %c10_142 = arith.constant 10 : index
    %c0_143 = arith.constant 0 : index
    %c1_144 = arith.constant 1 : index
    %123 = vector.load %arg2[%c0_141, %c10_142, %c0_143, %c1_144] : memref<1x16x4x26xf32, #tpu.memory_space<vmem>>, vector<1x1x4x20xf32>
    %124 = vector.shape_cast %123 : vector<1x1x4x20xf32> to vector<4x20xf32>
    %c20 = arith.constant 20 : index
    %c0_145 = arith.constant 0 : index
    %c0_146 = arith.constant 0 : index
    %125 = vector.load %arg3[%c20, %c0_145, %c0_146] : memref<49x32x4xf32, #tpu.memory_space<vmem>>, vector<1x32x4xf32>
    %126 = vector.shape_cast %125 : vector<1x32x4xf32> to vector<32x4xf32>
    %cst_147 = arith.constant dense<0.000000e+00> : vector<32x20xf32>
    %127 = tpu.matmul %126, %124, %cst_147 {dimension_numbers = #tpu.dot_dimension_numbers<[1], [0], [0], [1], [0, 0, 1, 1], [], []>} : vector<32x4xf32>, vector<4x20xf32>, vector<32x20xf32> -> vector<32x20xf32>
    %128 = arith.addf %122, %127 : vector<32x20xf32>
    %c0_148 = arith.constant 0 : index
    %c12_149 = arith.constant 12 : index
    %c0_150 = arith.constant 0 : index
    %c0_151 = arith.constant 0 : index
    %129 = vector.load %arg2[%c0_148, %c12_149, %c0_150, %c0_151] : memref<1x16x4x26xf32, #tpu.memory_space<vmem>>, vector<1x1x4x20xf32>
    %130 = vector.shape_cast %129 : vector<1x1x4x20xf32> to vector<4x20xf32>
    %c21 = arith.constant 21 : index
    %c0_152 = arith.constant 0 : index
    %c0_153 = arith.constant 0 : index
    %131 = vector.load %arg3[%c21, %c0_152, %c0_153] : memref<49x32x4xf32, #tpu.memory_space<vmem>>, vector<1x32x4xf32>
    %132 = vector.shape_cast %131 : vector<1x32x4xf32> to vector<32x4xf32>
    %cst_154 = arith.constant dense<0.000000e+00> : vector<32x20xf32>
    %133 = tpu.matmul %132, %130, %cst_154 {dimension_numbers = #tpu.dot_dimension_numbers<[1], [0], [0], [1], [0, 0, 1, 1], [], []>} : vector<32x4xf32>, vector<4x20xf32>, vector<32x20xf32> -> vector<32x20xf32>
    %134 = arith.addf %128, %133 : vector<32x20xf32>
    %c0_155 = arith.constant 0 : index
    %c13_156 = arith.constant 13 : index
    %c0_157 = arith.constant 0 : index
    %c0_158 = arith.constant 0 : index
    %135 = vector.load %arg2[%c0_155, %c13_156, %c0_157, %c0_158] : memref<1x16x4x26xf32, #tpu.memory_space<vmem>>, vector<1x1x4x20xf32>
    %136 = vector.shape_cast %135 : vector<1x1x4x20xf32> to vector<4x20xf32>
    %c22 = arith.constant 22 : index
    %c0_159 = arith.constant 0 : index
    %c0_160 = arith.constant 0 : index
    %137 = vector.load %arg3[%c22, %c0_159, %c0_160] : memref<49x32x4xf32, #tpu.memory_space<vmem>>, vector<1x32x4xf32>
    %138 = vector.shape_cast %137 : vector<1x32x4xf32> to vector<32x4xf32>
    %cst_161 = arith.constant dense<0.000000e+00> : vector<32x20xf32>
    %139 = tpu.matmul %138, %136, %cst_161 {dimension_numbers = #tpu.dot_dimension_numbers<[1], [0], [0], [1], [0, 0, 1, 1], [], []>} : vector<32x4xf32>, vector<4x20xf32>, vector<32x20xf32> -> vector<32x20xf32>
    %140 = arith.addf %134, %139 : vector<32x20xf32>
    %c0_162 = arith.constant 0 : index
    %c14_163 = arith.constant 14 : index
    %c0_164 = arith.constant 0 : index
    %c0_165 = arith.constant 0 : index
    %141 = vector.load %arg2[%c0_162, %c14_163, %c0_164, %c0_165] : memref<1x16x4x26xf32, #tpu.memory_space<vmem>>, vector<1x1x4x20xf32>
    %142 = vector.shape_cast %141 : vector<1x1x4x20xf32> to vector<4x20xf32>
    %c23 = arith.constant 23 : index
    %c0_166 = arith.constant 0 : index
    %c0_167 = arith.constant 0 : index
    %143 = vector.load %arg3[%c23, %c0_166, %c0_167] : memref<49x32x4xf32, #tpu.memory_space<vmem>>, vector<1x32x4xf32>
    %144 = vector.shape_cast %143 : vector<1x32x4xf32> to vector<32x4xf32>
    %cst_168 = arith.constant dense<0.000000e+00> : vector<32x20xf32>
    %145 = tpu.matmul %144, %142, %cst_168 {dimension_numbers = #tpu.dot_dimension_numbers<[1], [0], [0], [1], [0, 0, 1, 1], [], []>} : vector<32x4xf32>, vector<4x20xf32>, vector<32x20xf32> -> vector<32x20xf32>
    %146 = arith.addf %140, %145 : vector<32x20xf32>
    %c0_169 = arith.constant 0 : index
    %c15_170 = arith.constant 15 : index
    %c0_171 = arith.constant 0 : index
    %c0_172 = arith.constant 0 : index
    %147 = vector.load %arg2[%c0_169, %c15_170, %c0_171, %c0_172] : memref<1x16x4x26xf32, #tpu.memory_space<vmem>>, vector<1x1x4x20xf32>
    %148 = vector.shape_cast %147 : vector<1x1x4x20xf32> to vector<4x20xf32>
    %c24 = arith.constant 24 : index
    %c0_173 = arith.constant 0 : index
    %c0_174 = arith.constant 0 : index
    %149 = vector.load %arg3[%c24, %c0_173, %c0_174] : memref<49x32x4xf32, #tpu.memory_space<vmem>>, vector<1x32x4xf32>
    %150 = vector.shape_cast %149 : vector<1x32x4xf32> to vector<32x4xf32>
    %cst_175 = arith.constant dense<0.000000e+00> : vector<32x20xf32>
    %151 = tpu.matmul %150, %148, %cst_175 {dimension_numbers = #tpu.dot_dimension_numbers<[1], [0], [0], [1], [0, 0, 1, 1], [], []>} : vector<32x4xf32>, vector<4x20xf32>, vector<32x20xf32> -> vector<32x20xf32>
    %152 = arith.addf %146, %151 : vector<32x20xf32>
    %c0_176 = arith.constant 0 : index
    %c12_177 = arith.constant 12 : index
    %c0_178 = arith.constant 0 : index
    %c1_179 = arith.constant 1 : index
    %153 = vector.load %arg2[%c0_176, %c12_177, %c0_178, %c1_179] : memref<1x16x4x26xf32, #tpu.memory_space<vmem>>, vector<1x1x4x20xf32>
    %154 = vector.shape_cast %153 : vector<1x1x4x20xf32> to vector<4x20xf32>
    %c25 = arith.constant 25 : index
    %c0_180 = arith.constant 0 : index
    %c0_181 = arith.constant 0 : index
    %155 = vector.load %arg3[%c25, %c0_180, %c0_181] : memref<49x32x4xf32, #tpu.memory_space<vmem>>, vector<1x32x4xf32>
    %156 = vector.shape_cast %155 : vector<1x32x4xf32> to vector<32x4xf32>
    %cst_182 = arith.constant dense<0.000000e+00> : vector<32x20xf32>
    %157 = tpu.matmul %156, %154, %cst_182 {dimension_numbers = #tpu.dot_dimension_numbers<[1], [0], [0], [1], [0, 0, 1, 1], [], []>} : vector<32x4xf32>, vector<4x20xf32>, vector<32x20xf32> -> vector<32x20xf32>
    %158 = arith.addf %152, %157 : vector<32x20xf32>
    %c0_183 = arith.constant 0 : index
    %c13_184 = arith.constant 13 : index
    %c0_185 = arith.constant 0 : index
    %c1_186 = arith.constant 1 : index
    %159 = vector.load %arg2[%c0_183, %c13_184, %c0_185, %c1_186] : memref<1x16x4x26xf32, #tpu.memory_space<vmem>>, vector<1x1x4x20xf32>
    %160 = vector.shape_cast %159 : vector<1x1x4x20xf32> to vector<4x20xf32>
    %c26 = arith.constant 26 : index
    %c0_187 = arith.constant 0 : index
    %c0_188 = arith.constant 0 : index
    %161 = vector.load %arg3[%c26, %c0_187, %c0_188] : memref<49x32x4xf32, #tpu.memory_space<vmem>>, vector<1x32x4xf32>
    %162 = vector.shape_cast %161 : vector<1x32x4xf32> to vector<32x4xf32>
    %cst_189 = arith.constant dense<0.000000e+00> : vector<32x20xf32>
    %163 = tpu.matmul %162, %160, %cst_189 {dimension_numbers = #tpu.dot_dimension_numbers<[1], [0], [0], [1], [0, 0, 1, 1], [], []>} : vector<32x4xf32>, vector<4x20xf32>, vector<32x20xf32> -> vector<32x20xf32>
    %164 = arith.addf %158, %163 : vector<32x20xf32>
    %c0_190 = arith.constant 0 : index
    %c14_191 = arith.constant 14 : index
    %c0_192 = arith.constant 0 : index
    %c1_193 = arith.constant 1 : index
    %165 = vector.load %arg2[%c0_190, %c14_191, %c0_192, %c1_193] : memref<1x16x4x26xf32, #tpu.memory_space<vmem>>, vector<1x1x4x20xf32>
    %166 = vector.shape_cast %165 : vector<1x1x4x20xf32> to vector<4x20xf32>
    %c27 = arith.constant 27 : index
    %c0_194 = arith.constant 0 : index
    %c0_195 = arith.constant 0 : index
    %167 = vector.load %arg3[%c27, %c0_194, %c0_195] : memref<49x32x4xf32, #tpu.memory_space<vmem>>, vector<1x32x4xf32>
    %168 = vector.shape_cast %167 : vector<1x32x4xf32> to vector<32x4xf32>
    %cst_196 = arith.constant dense<0.000000e+00> : vector<32x20xf32>
    %169 = tpu.matmul %168, %166, %cst_196 {dimension_numbers = #tpu.dot_dimension_numbers<[1], [0], [0], [1], [0, 0, 1, 1], [], []>} : vector<32x4xf32>, vector<4x20xf32>, vector<32x20xf32> -> vector<32x20xf32>
    %170 = arith.addf %164, %169 : vector<32x20xf32>
    %c0_197 = arith.constant 0 : index
    %c0_198 = arith.constant 0 : index
    %c0_199 = arith.constant 0 : index
    %c5_200 = arith.constant 5 : index
    %171 = vector.load %arg2[%c0_197, %c0_198, %c0_199, %c5_200] : memref<1x16x4x26xf32, #tpu.memory_space<vmem>>, vector<1x1x4x20xf32>
    %172 = vector.shape_cast %171 : vector<1x1x4x20xf32> to vector<4x20xf32>
    %c28 = arith.constant 28 : index
    %c0_201 = arith.constant 0 : index
    %c0_202 = arith.constant 0 : index
    %173 = vector.load %arg3[%c28, %c0_201, %c0_202] : memref<49x32x4xf32, #tpu.memory_space<vmem>>, vector<1x32x4xf32>
    %174 = vector.shape_cast %173 : vector<1x32x4xf32> to vector<32x4xf32>
    %cst_203 = arith.constant dense<0.000000e+00> : vector<32x20xf32>
    %175 = tpu.matmul %174, %172, %cst_203 {dimension_numbers = #tpu.dot_dimension_numbers<[1], [0], [0], [1], [0, 0, 1, 1], [], []>} : vector<32x4xf32>, vector<4x20xf32>, vector<32x20xf32> -> vector<32x20xf32>
    %176 = arith.addf %170, %175 : vector<32x20xf32>
    %c0_204 = arith.constant 0 : index
    %c1_205 = arith.constant 1 : index
    %c0_206 = arith.constant 0 : index
    %c5_207 = arith.constant 5 : index
    %177 = vector.load %arg2[%c0_204, %c1_205, %c0_206, %c5_207] : memref<1x16x4x26xf32, #tpu.memory_space<vmem>>, vector<1x1x4x20xf32>
    %178 = vector.shape_cast %177 : vector<1x1x4x20xf32> to vector<4x20xf32>
    %c29 = arith.constant 29 : index
    %c0_208 = arith.constant 0 : index
    %c0_209 = arith.constant 0 : index
    %179 = vector.load %arg3[%c29, %c0_208, %c0_209] : memref<49x32x4xf32, #tpu.memory_space<vmem>>, vector<1x32x4xf32>
    %180 = vector.shape_cast %179 : vector<1x32x4xf32> to vector<32x4xf32>
    %cst_210 = arith.constant dense<0.000000e+00> : vector<32x20xf32>
    %181 = tpu.matmul %180, %178, %cst_210 {dimension_numbers = #tpu.dot_dimension_numbers<[1], [0], [0], [1], [0, 0, 1, 1], [], []>} : vector<32x4xf32>, vector<4x20xf32>, vector<32x20xf32> -> vector<32x20xf32>
    %182 = arith.addf %176, %181 : vector<32x20xf32>
    %c0_211 = arith.constant 0 : index
    %c2_212 = arith.constant 2 : index
    %c0_213 = arith.constant 0 : index
    %c5_214 = arith.constant 5 : index
    %183 = vector.load %arg2[%c0_211, %c2_212, %c0_213, %c5_214] : memref<1x16x4x26xf32, #tpu.memory_space<vmem>>, vector<1x1x4x20xf32>
    %184 = vector.shape_cast %183 : vector<1x1x4x20xf32> to vector<4x20xf32>
    %c30 = arith.constant 30 : index
    %c0_215 = arith.constant 0 : index
    %c0_216 = arith.constant 0 : index
    %185 = vector.load %arg3[%c30, %c0_215, %c0_216] : memref<49x32x4xf32, #tpu.memory_space<vmem>>, vector<1x32x4xf32>
    %186 = vector.shape_cast %185 : vector<1x32x4xf32> to vector<32x4xf32>
    %cst_217 = arith.constant dense<0.000000e+00> : vector<32x20xf32>
    %187 = tpu.matmul %186, %184, %cst_217 {dimension_numbers = #tpu.dot_dimension_numbers<[1], [0], [0], [1], [0, 0, 1, 1], [], []>} : vector<32x4xf32>, vector<4x20xf32>, vector<32x20xf32> -> vector<32x20xf32>
    %188 = arith.addf %182, %187 : vector<32x20xf32>
    %c0_218 = arith.constant 0 : index
    %c3_219 = arith.constant 3 : index
    %c0_220 = arith.constant 0 : index
    %c5_221 = arith.constant 5 : index
    %189 = vector.load %arg2[%c0_218, %c3_219, %c0_220, %c5_221] : memref<1x16x4x26xf32, #tpu.memory_space<vmem>>, vector<1x1x4x20xf32>
    %190 = vector.shape_cast %189 : vector<1x1x4x20xf32> to vector<4x20xf32>
    %c31 = arith.constant 31 : index
    %c0_222 = arith.constant 0 : index
    %c0_223 = arith.constant 0 : index
    %191 = vector.load %arg3[%c31, %c0_222, %c0_223] : memref<49x32x4xf32, #tpu.memory_space<vmem>>, vector<1x32x4xf32>
    %192 = vector.shape_cast %191 : vector<1x32x4xf32> to vector<32x4xf32>
    %cst_224 = arith.constant dense<0.000000e+00> : vector<32x20xf32>
    %193 = tpu.matmul %192, %190, %cst_224 {dimension_numbers = #tpu.dot_dimension_numbers<[1], [0], [0], [1], [0, 0, 1, 1], [], []>} : vector<32x4xf32>, vector<4x20xf32>, vector<32x20xf32> -> vector<32x20xf32>
    %194 = arith.addf %188, %193 : vector<32x20xf32>
    %c0_225 = arith.constant 0 : index
    %c0_226 = arith.constant 0 : index
    %c0_227 = arith.constant 0 : index
    %c6_228 = arith.constant 6 : index
    %195 = vector.load %arg2[%c0_225, %c0_226, %c0_227, %c6_228] : memref<1x16x4x26xf32, #tpu.memory_space<vmem>>, vector<1x1x4x20xf32>
    %196 = vector.shape_cast %195 : vector<1x1x4x20xf32> to vector<4x20xf32>
    %c32 = arith.constant 32 : index
    %c0_229 = arith.constant 0 : index
    %c0_230 = arith.constant 0 : index
    %197 = vector.load %arg3[%c32, %c0_229, %c0_230] : memref<49x32x4xf32, #tpu.memory_space<vmem>>, vector<1x32x4xf32>
    %198 = vector.shape_cast %197 : vector<1x32x4xf32> to vector<32x4xf32>
    %cst_231 = arith.constant dense<0.000000e+00> : vector<32x20xf32>
    %199 = tpu.matmul %198, %196, %cst_231 {dimension_numbers = #tpu.dot_dimension_numbers<[1], [0], [0], [1], [0, 0, 1, 1], [], []>} : vector<32x4xf32>, vector<4x20xf32>, vector<32x20xf32> -> vector<32x20xf32>
    %200 = arith.addf %194, %199 : vector<32x20xf32>
    %c0_232 = arith.constant 0 : index
    %c1_233 = arith.constant 1 : index
    %c0_234 = arith.constant 0 : index
    %c6_235 = arith.constant 6 : index
    %201 = vector.load %arg2[%c0_232, %c1_233, %c0_234, %c6_235] : memref<1x16x4x26xf32, #tpu.memory_space<vmem>>, vector<1x1x4x20xf32>
    %202 = vector.shape_cast %201 : vector<1x1x4x20xf32> to vector<4x20xf32>
    %c33 = arith.constant 33 : index
    %c0_236 = arith.constant 0 : index
    %c0_237 = arith.constant 0 : index
    %203 = vector.load %arg3[%c33, %c0_236, %c0_237] : memref<49x32x4xf32, #tpu.memory_space<vmem>>, vector<1x32x4xf32>
    %204 = vector.shape_cast %203 : vector<1x32x4xf32> to vector<32x4xf32>
    %cst_238 = arith.constant dense<0.000000e+00> : vector<32x20xf32>
    %205 = tpu.matmul %204, %202, %cst_238 {dimension_numbers = #tpu.dot_dimension_numbers<[1], [0], [0], [1], [0, 0, 1, 1], [], []>} : vector<32x4xf32>, vector<4x20xf32>, vector<32x20xf32> -> vector<32x20xf32>
    %206 = arith.addf %200, %205 : vector<32x20xf32>
    %c0_239 = arith.constant 0 : index
    %c2_240 = arith.constant 2 : index
    %c0_241 = arith.constant 0 : index
    %c6_242 = arith.constant 6 : index
    %207 = vector.load %arg2[%c0_239, %c2_240, %c0_241, %c6_242] : memref<1x16x4x26xf32, #tpu.memory_space<vmem>>, vector<1x1x4x20xf32>
    %208 = vector.shape_cast %207 : vector<1x1x4x20xf32> to vector<4x20xf32>
    %c34 = arith.constant 34 : index
    %c0_243 = arith.constant 0 : index
    %c0_244 = arith.constant 0 : index
    %209 = vector.load %arg3[%c34, %c0_243, %c0_244] : memref<49x32x4xf32, #tpu.memory_space<vmem>>, vector<1x32x4xf32>
    %210 = vector.shape_cast %209 : vector<1x32x4xf32> to vector<32x4xf32>
    %cst_245 = arith.constant dense<0.000000e+00> : vector<32x20xf32>
    %211 = tpu.matmul %210, %208, %cst_245 {dimension_numbers = #tpu.dot_dimension_numbers<[1], [0], [0], [1], [0, 0, 1, 1], [], []>} : vector<32x4xf32>, vector<4x20xf32>, vector<32x20xf32> -> vector<32x20xf32>
    %212 = arith.addf %206, %211 : vector<32x20xf32>
    %c0_246 = arith.constant 0 : index
    %c4_247 = arith.constant 4 : index
    %c0_248 = arith.constant 0 : index
    %c5_249 = arith.constant 5 : index
    %213 = vector.load %arg2[%c0_246, %c4_247, %c0_248, %c5_249] : memref<1x16x4x26xf32, #tpu.memory_space<vmem>>, vector<1x1x4x20xf32>
    %214 = vector.shape_cast %213 : vector<1x1x4x20xf32> to vector<4x20xf32>
    %c35 = arith.constant 35 : index
    %c0_250 = arith.constant 0 : index
    %c0_251 = arith.constant 0 : index
    %215 = vector.load %arg3[%c35, %c0_250, %c0_251] : memref<49x32x4xf32, #tpu.memory_space<vmem>>, vector<1x32x4xf32>
    %216 = vector.shape_cast %215 : vector<1x32x4xf32> to vector<32x4xf32>
    %cst_252 = arith.constant dense<0.000000e+00> : vector<32x20xf32>
    %217 = tpu.matmul %216, %214, %cst_252 {dimension_numbers = #tpu.dot_dimension_numbers<[1], [0], [0], [1], [0, 0, 1, 1], [], []>} : vector<32x4xf32>, vector<4x20xf32>, vector<32x20xf32> -> vector<32x20xf32>
    %218 = arith.addf %212, %217 : vector<32x20xf32>
    %c0_253 = arith.constant 0 : index
    %c5_254 = arith.constant 5 : index
    %c0_255 = arith.constant 0 : index
    %c5_256 = arith.constant 5 : index
    %219 = vector.load %arg2[%c0_253, %c5_254, %c0_255, %c5_256] : memref<1x16x4x26xf32, #tpu.memory_space<vmem>>, vector<1x1x4x20xf32>
    %220 = vector.shape_cast %219 : vector<1x1x4x20xf32> to vector<4x20xf32>
    %c36 = arith.constant 36 : index
    %c0_257 = arith.constant 0 : index
    %c0_258 = arith.constant 0 : index
    %221 = vector.load %arg3[%c36, %c0_257, %c0_258] : memref<49x32x4xf32, #tpu.memory_space<vmem>>, vector<1x32x4xf32>
    %222 = vector.shape_cast %221 : vector<1x32x4xf32> to vector<32x4xf32>
    %cst_259 = arith.constant dense<0.000000e+00> : vector<32x20xf32>
    %223 = tpu.matmul %222, %220, %cst_259 {dimension_numbers = #tpu.dot_dimension_numbers<[1], [0], [0], [1], [0, 0, 1, 1], [], []>} : vector<32x4xf32>, vector<4x20xf32>, vector<32x20xf32> -> vector<32x20xf32>
    %224 = arith.addf %218, %223 : vector<32x20xf32>
    %c0_260 = arith.constant 0 : index
    %c6_261 = arith.constant 6 : index
    %c0_262 = arith.constant 0 : index
    %c5_263 = arith.constant 5 : index
    %225 = vector.load %arg2[%c0_260, %c6_261, %c0_262, %c5_263] : memref<1x16x4x26xf32, #tpu.memory_space<vmem>>, vector<1x1x4x20xf32>
    %226 = vector.shape_cast %225 : vector<1x1x4x20xf32> to vector<4x20xf32>
    %c37 = arith.constant 37 : index
    %c0_264 = arith.constant 0 : index
    %c0_265 = arith.constant 0 : index
    %227 = vector.load %arg3[%c37, %c0_264, %c0_265] : memref<49x32x4xf32, #tpu.memory_space<vmem>>, vector<1x32x4xf32>
    %228 = vector.shape_cast %227 : vector<1x32x4xf32> to vector<32x4xf32>
    %cst_266 = arith.constant dense<0.000000e+00> : vector<32x20xf32>
    %229 = tpu.matmul %228, %226, %cst_266 {dimension_numbers = #tpu.dot_dimension_numbers<[1], [0], [0], [1], [0, 0, 1, 1], [], []>} : vector<32x4xf32>, vector<4x20xf32>, vector<32x20xf32> -> vector<32x20xf32>
    %230 = arith.addf %224, %229 : vector<32x20xf32>
    %c0_267 = arith.constant 0 : index
    %c7_268 = arith.constant 7 : index
    %c0_269 = arith.constant 0 : index
    %c5_270 = arith.constant 5 : index
    %231 = vector.load %arg2[%c0_267, %c7_268, %c0_269, %c5_270] : memref<1x16x4x26xf32, #tpu.memory_space<vmem>>, vector<1x1x4x20xf32>
    %232 = vector.shape_cast %231 : vector<1x1x4x20xf32> to vector<4x20xf32>
    %c38 = arith.constant 38 : index
    %c0_271 = arith.constant 0 : index
    %c0_272 = arith.constant 0 : index
    %233 = vector.load %arg3[%c38, %c0_271, %c0_272] : memref<49x32x4xf32, #tpu.memory_space<vmem>>, vector<1x32x4xf32>
    %234 = vector.shape_cast %233 : vector<1x32x4xf32> to vector<32x4xf32>
    %cst_273 = arith.constant dense<0.000000e+00> : vector<32x20xf32>
    %235 = tpu.matmul %234, %232, %cst_273 {dimension_numbers = #tpu.dot_dimension_numbers<[1], [0], [0], [1], [0, 0, 1, 1], [], []>} : vector<32x4xf32>, vector<4x20xf32>, vector<32x20xf32> -> vector<32x20xf32>
    %236 = arith.addf %230, %235 : vector<32x20xf32>
    %c0_274 = arith.constant 0 : index
    %c4_275 = arith.constant 4 : index
    %c0_276 = arith.constant 0 : index
    %c6_277 = arith.constant 6 : index
    %237 = vector.load %arg2[%c0_274, %c4_275, %c0_276, %c6_277] : memref<1x16x4x26xf32, #tpu.memory_space<vmem>>, vector<1x1x4x20xf32>
    %238 = vector.shape_cast %237 : vector<1x1x4x20xf32> to vector<4x20xf32>
    %c39 = arith.constant 39 : index
    %c0_278 = arith.constant 0 : index
    %c0_279 = arith.constant 0 : index
    %239 = vector.load %arg3[%c39, %c0_278, %c0_279] : memref<49x32x4xf32, #tpu.memory_space<vmem>>, vector<1x32x4xf32>
    %240 = vector.shape_cast %239 : vector<1x32x4xf32> to vector<32x4xf32>
    %cst_280 = arith.constant dense<0.000000e+00> : vector<32x20xf32>
    %241 = tpu.matmul %240, %238, %cst_280 {dimension_numbers = #tpu.dot_dimension_numbers<[1], [0], [0], [1], [0, 0, 1, 1], [], []>} : vector<32x4xf32>, vector<4x20xf32>, vector<32x20xf32> -> vector<32x20xf32>
    %242 = arith.addf %236, %241 : vector<32x20xf32>
    %c0_281 = arith.constant 0 : index
    %c5_282 = arith.constant 5 : index
    %c0_283 = arith.constant 0 : index
    %c6_284 = arith.constant 6 : index
    %243 = vector.load %arg2[%c0_281, %c5_282, %c0_283, %c6_284] : memref<1x16x4x26xf32, #tpu.memory_space<vmem>>, vector<1x1x4x20xf32>
    %244 = vector.shape_cast %243 : vector<1x1x4x20xf32> to vector<4x20xf32>
    %c40 = arith.constant 40 : index
    %c0_285 = arith.constant 0 : index
    %c0_286 = arith.constant 0 : index
    %245 = vector.load %arg3[%c40, %c0_285, %c0_286] : memref<49x32x4xf32, #tpu.memory_space<vmem>>, vector<1x32x4xf32>
    %246 = vector.shape_cast %245 : vector<1x32x4xf32> to vector<32x4xf32>
    %cst_287 = arith.constant dense<0.000000e+00> : vector<32x20xf32>
    %247 = tpu.matmul %246, %244, %cst_287 {dimension_numbers = #tpu.dot_dimension_numbers<[1], [0], [0], [1], [0, 0, 1, 1], [], []>} : vector<32x4xf32>, vector<4x20xf32>, vector<32x20xf32> -> vector<32x20xf32>
    %248 = arith.addf %242, %247 : vector<32x20xf32>
    %c0_288 = arith.constant 0 : index
    %c6_289 = arith.constant 6 : index
    %c0_290 = arith.constant 0 : index
    %c6_291 = arith.constant 6 : index
    %249 = vector.load %arg2[%c0_288, %c6_289, %c0_290, %c6_291] : memref<1x16x4x26xf32, #tpu.memory_space<vmem>>, vector<1x1x4x20xf32>
    %250 = vector.shape_cast %249 : vector<1x1x4x20xf32> to vector<4x20xf32>
    %c41 = arith.constant 41 : index
    %c0_292 = arith.constant 0 : index
    %c0_293 = arith.constant 0 : index
    %251 = vector.load %arg3[%c41, %c0_292, %c0_293] : memref<49x32x4xf32, #tpu.memory_space<vmem>>, vector<1x32x4xf32>
    %252 = vector.shape_cast %251 : vector<1x32x4xf32> to vector<32x4xf32>
    %cst_294 = arith.constant dense<0.000000e+00> : vector<32x20xf32>
    %253 = tpu.matmul %252, %250, %cst_294 {dimension_numbers = #tpu.dot_dimension_numbers<[1], [0], [0], [1], [0, 0, 1, 1], [], []>} : vector<32x4xf32>, vector<4x20xf32>, vector<32x20xf32> -> vector<32x20xf32>
    %254 = arith.addf %248, %253 : vector<32x20xf32>
    %c0_295 = arith.constant 0 : index
    %c8_296 = arith.constant 8 : index
    %c0_297 = arith.constant 0 : index
    %c5_298 = arith.constant 5 : index
    %255 = vector.load %arg2[%c0_295, %c8_296, %c0_297, %c5_298] : memref<1x16x4x26xf32, #tpu.memory_space<vmem>>, vector<1x1x4x20xf32>
    %256 = vector.shape_cast %255 : vector<1x1x4x20xf32> to vector<4x20xf32>
    %c42 = arith.constant 42 : index
    %c0_299 = arith.constant 0 : index
    %c0_300 = arith.constant 0 : index
    %257 = vector.load %arg3[%c42, %c0_299, %c0_300] : memref<49x32x4xf32, #tpu.memory_space<vmem>>, vector<1x32x4xf32>
    %258 = vector.shape_cast %257 : vector<1x32x4xf32> to vector<32x4xf32>
    %cst_301 = arith.constant dense<0.000000e+00> : vector<32x20xf32>
    %259 = tpu.matmul %258, %256, %cst_301 {dimension_numbers = #tpu.dot_dimension_numbers<[1], [0], [0], [1], [0, 0, 1, 1], [], []>} : vector<32x4xf32>, vector<4x20xf32>, vector<32x20xf32> -> vector<32x20xf32>
    %260 = arith.addf %254, %259 : vector<32x20xf32>
    %c0_302 = arith.constant 0 : index
    %c9_303 = arith.constant 9 : index
    %c0_304 = arith.constant 0 : index
    %c5_305 = arith.constant 5 : index
    %261 = vector.load %arg2[%c0_302, %c9_303, %c0_304, %c5_305] : memref<1x16x4x26xf32, #tpu.memory_space<vmem>>, vector<1x1x4x20xf32>
    %262 = vector.shape_cast %261 : vector<1x1x4x20xf32> to vector<4x20xf32>
    %c43 = arith.constant 43 : index
    %c0_306 = arith.constant 0 : index
    %c0_307 = arith.constant 0 : index
    %263 = vector.load %arg3[%c43, %c0_306, %c0_307] : memref<49x32x4xf32, #tpu.memory_space<vmem>>, vector<1x32x4xf32>
    %264 = vector.shape_cast %263 : vector<1x32x4xf32> to vector<32x4xf32>
    %cst_308 = arith.constant dense<0.000000e+00> : vector<32x20xf32>
    %265 = tpu.matmul %264, %262, %cst_308 {dimension_numbers = #tpu.dot_dimension_numbers<[1], [0], [0], [1], [0, 0, 1, 1], [], []>} : vector<32x4xf32>, vector<4x20xf32>, vector<32x20xf32> -> vector<32x20xf32>
    %266 = arith.addf %260, %265 : vector<32x20xf32>
    %c0_309 = arith.constant 0 : index
    %c10_310 = arith.constant 10 : index
    %c0_311 = arith.constant 0 : index
    %c5_312 = arith.constant 5 : index
    %267 = vector.load %arg2[%c0_309, %c10_310, %c0_311, %c5_312] : memref<1x16x4x26xf32, #tpu.memory_space<vmem>>, vector<1x1x4x20xf32>
    %268 = vector.shape_cast %267 : vector<1x1x4x20xf32> to vector<4x20xf32>
    %c44 = arith.constant 44 : index
    %c0_313 = arith.constant 0 : index
    %c0_314 = arith.constant 0 : index
    %269 = vector.load %arg3[%c44, %c0_313, %c0_314] : memref<49x32x4xf32, #tpu.memory_space<vmem>>, vector<1x32x4xf32>
    %270 = vector.shape_cast %269 : vector<1x32x4xf32> to vector<32x4xf32>
    %cst_315 = arith.constant dense<0.000000e+00> : vector<32x20xf32>
    %271 = tpu.matmul %270, %268, %cst_315 {dimension_numbers = #tpu.dot_dimension_numbers<[1], [0], [0], [1], [0, 0, 1, 1], [], []>} : vector<32x4xf32>, vector<4x20xf32>, vector<32x20xf32> -> vector<32x20xf32>
    %272 = arith.addf %266, %271 : vector<32x20xf32>
    %c0_316 = arith.constant 0 : index
    %c11_317 = arith.constant 11 : index
    %c0_318 = arith.constant 0 : index
    %c5_319 = arith.constant 5 : index
    %273 = vector.load %arg2[%c0_316, %c11_317, %c0_318, %c5_319] : memref<1x16x4x26xf32, #tpu.memory_space<vmem>>, vector<1x1x4x20xf32>
    %274 = vector.shape_cast %273 : vector<1x1x4x20xf32> to vector<4x20xf32>
    %c45 = arith.constant 45 : index
    %c0_320 = arith.constant 0 : index
    %c0_321 = arith.constant 0 : index
    %275 = vector.load %arg3[%c45, %c0_320, %c0_321] : memref<49x32x4xf32, #tpu.memory_space<vmem>>, vector<1x32x4xf32>
    %276 = vector.shape_cast %275 : vector<1x32x4xf32> to vector<32x4xf32>
    %cst_322 = arith.constant dense<0.000000e+00> : vector<32x20xf32>
    %277 = tpu.matmul %276, %274, %cst_322 {dimension_numbers = #tpu.dot_dimension_numbers<[1], [0], [0], [1], [0, 0, 1, 1], [], []>} : vector<32x4xf32>, vector<4x20xf32>, vector<32x20xf32> -> vector<32x20xf32>
    %278 = arith.addf %272, %277 : vector<32x20xf32>
    %c0_323 = arith.constant 0 : index
    %c8_324 = arith.constant 8 : index
    %c0_325 = arith.constant 0 : index
    %c6_326 = arith.constant 6 : index
    %279 = vector.load %arg2[%c0_323, %c8_324, %c0_325, %c6_326] : memref<1x16x4x26xf32, #tpu.memory_space<vmem>>, vector<1x1x4x20xf32>
    %280 = vector.shape_cast %279 : vector<1x1x4x20xf32> to vector<4x20xf32>
    %c46 = arith.constant 46 : index
    %c0_327 = arith.constant 0 : index
    %c0_328 = arith.constant 0 : index
    %281 = vector.load %arg3[%c46, %c0_327, %c0_328] : memref<49x32x4xf32, #tpu.memory_space<vmem>>, vector<1x32x4xf32>
    %282 = vector.shape_cast %281 : vector<1x32x4xf32> to vector<32x4xf32>
    %cst_329 = arith.constant dense<0.000000e+00> : vector<32x20xf32>
    %283 = tpu.matmul %282, %280, %cst_329 {dimension_numbers = #tpu.dot_dimension_numbers<[1], [0], [0], [1], [0, 0, 1, 1], [], []>} : vector<32x4xf32>, vector<4x20xf32>, vector<32x20xf32> -> vector<32x20xf32>
    %284 = arith.addf %278, %283 : vector<32x20xf32>
    %c0_330 = arith.constant 0 : index
    %c9_331 = arith.constant 9 : index
    %c0_332 = arith.constant 0 : index
    %c6_333 = arith.constant 6 : index
    %285 = vector.load %arg2[%c0_330, %c9_331, %c0_332, %c6_333] : memref<1x16x4x26xf32, #tpu.memory_space<vmem>>, vector<1x1x4x20xf32>
    %286 = vector.shape_cast %285 : vector<1x1x4x20xf32> to vector<4x20xf32>
    %c47 = arith.constant 47 : index
    %c0_334 = arith.constant 0 : index
    %c0_335 = arith.constant 0 : index
    %287 = vector.load %arg3[%c47, %c0_334, %c0_335] : memref<49x32x4xf32, #tpu.memory_space<vmem>>, vector<1x32x4xf32>
    %288 = vector.shape_cast %287 : vector<1x32x4xf32> to vector<32x4xf32>
    %cst_336 = arith.constant dense<0.000000e+00> : vector<32x20xf32>
    %289 = tpu.matmul %288, %286, %cst_336 {dimension_numbers = #tpu.dot_dimension_numbers<[1], [0], [0], [1], [0, 0, 1, 1], [], []>} : vector<32x4xf32>, vector<4x20xf32>, vector<32x20xf32> -> vector<32x20xf32>
    %290 = arith.addf %284, %289 : vector<32x20xf32>
    %c0_337 = arith.constant 0 : index
    %c10_338 = arith.constant 10 : index
    %c0_339 = arith.constant 0 : index
    %c6_340 = arith.constant 6 : index
    %291 = vector.load %arg2[%c0_337, %c10_338, %c0_339, %c6_340] : memref<1x16x4x26xf32, #tpu.memory_space<vmem>>, vector<1x1x4x20xf32>
    %292 = vector.shape_cast %291 : vector<1x1x4x20xf32> to vector<4x20xf32>
    %c48 = arith.constant 48 : index
    %c0_341 = arith.constant 0 : index
    %c0_342 = arith.constant 0 : index
    %293 = vector.load %arg3[%c48, %c0_341, %c0_342] : memref<49x32x4xf32, #tpu.memory_space<vmem>>, vector<1x32x4xf32>
    %294 = vector.shape_cast %293 : vector<1x32x4xf32> to vector<32x4xf32>
    %cst_343 = arith.constant dense<0.000000e+00> : vector<32x20xf32>
    %295 = tpu.matmul %294, %292, %cst_343 {dimension_numbers = #tpu.dot_dimension_numbers<[1], [0], [0], [1], [0, 0, 1, 1], [], []>} : vector<32x4xf32>, vector<4x20xf32>, vector<32x20xf32> -> vector<32x20xf32>
    %296 = arith.addf %290, %295 : vector<32x20xf32>
    %c0_344 = arith.constant 0 : index
    %c0_345 = arith.constant 0 : index
    %c0_346 = arith.constant 0 : index
    %297 = vector.load %arg5[%c0_344, %c0_345, %c0_346] : memref<1x32x20xf32, #tpu.memory_space<vmem>>, vector<1x32x20xf32>
    %298 = vector.shape_cast %297 : vector<1x32x20xf32> to vector<32x20xf32>
    %299 = vector.shape_cast %296 : vector<32x20xf32> to vector<1x32x20xf32>
    tpu.vector_store %arg5[%c0_344, %c0_345, %c0_346], %299 {strides = array<i32>} : memref<1x32x20xf32, #tpu.memory_space<vmem>>, vector<1x32x20xf32>,
    return
  }
  func.func @transform_0(%arg0: i32, %arg1: i32) -> (i32, i32, i32, i32) {
    %c0_i32 = arith.constant 0 : i32
    %c0_i32_0 = arith.constant 0 : i32
    %c0_i32_1 = arith.constant 0 : i32
    %c0_i32_2 = arith.constant 0 : i32
    return %arg0, %c0_i32, %c0_i32_0, %c0_i32_1 : i32, i32, i32, i32
  }
  func.func @transform_1(%arg0: i32, %arg1: i32) -> (i32, i32, i32) {
    %c0_i32 = arith.constant 0 : i32
    %c0_i32_0 = arith.constant 0 : i32
    %c0_i32_1 = arith.constant 0 : i32
    %c0_i32_2 = arith.constant 0 : i32
    return %c0_i32, %c0_i32_0, %c0_i32_1 : i32, i32, i32
  }
  func.func @transform_2(%arg0: i32, %arg1: i32) -> (i32, i32) {
    %c0_i32 = arith.constant 0 : i32
    %c0_i32_0 = arith.constant 0 : i32
    %c0_i32_1 = arith.constant 0 : i32
    return %c0_i32, %c0_i32_0 : i32, i32
  }
  func.func @transform_3(%arg0: i32, %arg1: i32) -> (i32, i32, i32) {
    %c0_i32 = arith.constant 0 : i32
    %c0_i32_0 = arith.constant 0 : i32
    return %arg0, %c0_i32, %arg1 : i32, i32, i32
  }
}

</mosaic_0001>

<bundles_post_ra>
// kernel: overlap_patch_embedding.1
= control target key start
LH: loop header
LB: loop body
LE: loop exit
PB: predicated region body
PF: predicated region fallthrough
CT: control target
= control target key end

     0   :  { %s7083_s12 = smov 0   ;;  %s7085_s13 = smov 0   ;;  %s8140_s0 = inlined_call_operand.vmem [shape: f32[2,16,4,26], index: 0, kind: input, shape index: {}]   ;;  %s8141_s1 = inlined_call_operand.vmem [shape: f32[49,32,4], index: 1, kind: input, shape index: {}]   ;;  %s8142_s2 = inlined_call_operand.vmem [shape: f32[32,1], index: 2, kind: input, shape index: {}]   ;;  %s8143_s3 = inlined_call_operand.vmem [shape: f32[2,32,20], index: 3, kind: output, shape index: {}]  }
   0x1   :  { %s7087_s14 = smov 0  }
   0x2 LB: > { %s25_s15 = sadd.s32 1, %s7053_s13  ;;  %p5707_p0 = scmp.ge.s32.totalorder %s7057_s14, 1  ;;  %s7057_s14 = sphi %s7087_s14, %s13_s14   ;;  %s7053_s13 = sphi %s7085_s13, %s8145_s13   ;;  %s7049_s12 = sphi %s7083_s12, %s8144_s12  }
   0x3   : > { %p27_p1 = scmp.ge.s32.totalorder %s25_s15, 2  ;;  %p151_p2 = scmp.lt.s32.totalorder %s7057_s14, 3 }
   0x5   : > { %s8147_s15 = smov (%p27_p1, %s25_s15), 0  ;;  %p152_p3 = pnand %p5707_p0, %p151_p2 }
   0x6   : > { %p178_p4 = scmp.lt.s32.totalorder (!%p152_p3), %s7049_s12, 1  ;;  %v216_v0 = vld [vmem:[%s8141_s1] sm:$0xff] (!%p152_p3)  ;;  %vm220_vm0 = vcmask (!%p152_p3), 31744   ;;  %vm233_vm1 = vcmask (!%p152_p3), 1043456   ;;  %s7059_s24 = smov (!%p152_p3), 127   ;;  %v217_v5 = vld [vmem:[%s8141_s1 + $0x8] sm:$0xff] (!%p152_p3) }
   0x7   : > { %155 = sbr.rel (%p152_p3) target bundleno = 539 (0x21b), region = 32  ;;  %6415 = vmatprep.mubr.msk.f32.mxu1 (!%p152_p3), %vm220_vm0, %v216_v0  ;;  %v5939_v1 = vld [vmem:[%s8141_s1 + $0x300] sm:$0xff] (!%p152_p3)  ;;  %v218_v8 = vld [vmem:[%s8141_s1 + $0x10] sm:$0xff] (!%p152_p3)  ;;  %v219_v10 = vld [vmem:[%s8141_s1 + $0x18] sm:$0xff] (!%p152_p3)  ;;  %s7060_s10 = smov (!%p152_p3), 123   ;;  %vm5621_vm2 = vcmask (!%p152_p3), 162816  }
   0x8   : > { %6607 = vmatprep.mubr.msk.f32.mxu0 (!%p152_p3), %vm220_vm0, %v5939_v1  ;;  %v5718_v12 = vld [vmem:[%s8141_s1 + $0x20] sm:$0xff] (!%p152_p3)  ;;  %v5940_v13 = vld [vmem:[%s8141_s1 + $0x308] sm:$0xff] (!%p152_p3)  ;;  %v5720_v16 = vld [vmem:[%s8141_s1 + $0x30] sm:$0xff] (!%p152_p3)  ;;  %s7061_s29 = smov (!%p152_p3), 122  }
   0x9   : > { %v5948_v14 = vld [vmem:[%s8141_s1 + $0x320] sm:$0xff] (!%p152_p3)  ;;  %v5719_v15 = vld [vmem:[%s8141_s1 + $0x28] sm:$0xff] (!%p152_p3)  ;;  %v5721_v17 = vld [vmem:[%s8141_s1 + $0x38] sm:$0xff] (!%p152_p3) }
   0xa   : > { %v5728_v19 = vld [vmem:[%s8141_s1 + $0x40] sm:$0xff] (!%p152_p3)  ;;  %v5729_v20 = vld [vmem:[%s8141_s1 + $0x48] sm:$0xff] (!%p152_p3)  ;;  %v5730_v21 = vld [vmem:[%s8141_s1 + $0x50] sm:$0xff] (!%p152_p3) }
   0xb   : > { %v5731_v22 = vld [vmem:[%s8141_s1 + $0x58] sm:$0xff] (!%p152_p3)  ;;  %v5738_v24 = vld [vmem:[%s8141_s1 + $0x60] sm:$0xff] (!%p152_p3)  ;;  %v5739_v25 = vld [vmem:[%s8141_s1 + $0x68] sm:$0xff] (!%p152_p3) }
   0xc   : > { %v5740_v27 = vld [vmem:[%s8141_s1 + $0x70] sm:$0xff] (!%p152_p3)  ;;  %v5741_v28 = vld [vmem:[%s8141_s1 + $0x78] sm:$0xff] (!%p152_p3)  ;;  %v5747_v30 = vld [vmem:[%s8141_s1 + $0x80] sm:$0xff] (!%p152_p3) }
   0xd   : > { %v5949_v38 = vld [vmem:[%s8141_s1 + $0x328] sm:$0xff] (!%p152_p3)  ;;  %v5950_v39 = vld [vmem:[%s8141_s1 + $0x330] sm:$0xff] (!%p152_p3)  ;;  %v5951_v41 = vld [vmem:[%s8141_s1 + $0x338] sm:$0xff] (!%p152_p3) }
   0xe   : > { %s8149_s12 = smov (!%p178_p4, %s7049_s12), 1  ;;  %v5748_v43 = vld [vmem:[%s8141_s1 + $0x88] sm:$0xff]  ;;  %v5957_v44 = vld [vmem:[%s8141_s1 + $0x340] sm:$0xff]  ;;  %v5749_v45 = vld [vmem:[%s8141_s1 + $0x90] sm:$0xff] }
   0xf   : > { %s6166_s18 = sshll.u32 %s8149_s12, 6  ;;  %v5750_v46 = vld [vmem:[%s8141_s1 + $0x98] sm:$0xff]  ;;  %v5958_v47 = vld [vmem:[%s8141_s1 + $0x348] sm:$0xff]  ;;  %v5756_v49 = vld [vmem:[%s8141_s1 + $0xa0] sm:$0xff]  ;;  %s6167_s26 = sshll.u32 %s8149_s12, 5 }
  0x10   : > { %s7114_s23 = scalar_lea.vmem %s8140_s0, %s6166_s18  ;;  %v5959_v50 = vld [vmem:[%s8141_s1 + $0x350] sm:$0xff]  ;;  %v5757_v52 = vld [vmem:[%s8141_s1 + $0xa8] sm:$0xff]  ;;  %v5960_v53 = vld [vmem:[%s8141_s1 + $0x358] sm:$0xff] }
  0x11   : > { %v7118_v2 = vld [vmem:[%s7114_s23 + $0x38] sm:$0xf]  ;;  %v7121_v3 = vld [vmem:[%s7114_s23 + $0x30] sm:$0xf]  ;;  %v215_v4 = vld [vmem:[%s7114_s23] sm:$0xf] }
  0x12   : > { %3206 = vrot.lane.b32.xlu1 %v7118_v2, %s7059_s24  ;;  %2986 = vrot.lane.b32.xlu0 %v7121_v3, %s7059_s24  ;;  %v7132_v6 = vld [vmem:[%s7114_s23 + $0x34] sm:$0xf]  ;;  %v5717_v7 = vld [vmem:[%s7114_s23 + $0x4] sm:$0xf] }
  0x13   : > { %6413 = vmatprep.subr.msk.mxu1 %vm233_vm1, %v215_v4  ;;  %v7143_v9 = vld [vmem:[%s7114_s23 + $0x3c] sm:$0xf]  ;;  %v5727_v11 = vld [vmem:[%s7114_s23 + $0x8] sm:$0xf]  ;;  %v5737_v18 = vld [vmem:[%s7114_s23 + $0xc] sm:$0xf] }
  0x14   : > { %6414 = vmatpush3.msk.msra.mxu1 %vm233_vm1, %v215_v4  ;;  %6605 = vmatprep.subr.msk.mxu0 %vm233_vm1, %v7143_v9  ;;  %v7210_v23 = vld [vmem:[%s7114_s23 + $0x10] sm:$0xf]  ;;  %v7225_v26 = vld [vmem:[%s7114_s23 + $0x14] sm:$0xf]  ;;  %v7240_v29 = vld [vmem:[%s7114_s23 + $0x18] sm:$0xf] }
  0x15   : > { %6416 = vmatmul.mubr.msk.f32.vlgmr.msra.gmra.mrb[0].mxu1 %vm220_vm0, %v217_v5  ;;  %6421 = vmatprep.subr.msk.mxu1 %vm233_vm1, %v5717_v7  ;;  %v7252_v31 = vld [vmem:[%s7114_s23 + $0x1c] sm:$0xf]  ;;  %v7264_v32 = vld [vmem:[%s7114_s23 + $0x20] sm:$0xf]  ;;  %v7271_v33 = vld [vmem:[%s7114_s23 + $0x24] sm:$0xf] }
  0x16   : > { %664 = vrot.lane.b32.xlu1 %v215_v4, %s7059_s24  ;;  %3096 = vrot.lane.b32.xlu0 %v7132_v6, %s7059_s24  ;;  %v7278_v34 = vld [vmem:[%s7114_s23 + $0x28] sm:$0xf]  ;;  %v7285_v35 = vld [vmem:[%s7114_s23 + $0x2c] sm:$0xf] }
  0x17   : > { %6418 = vmatprep.mubr.msk.f32.mxu1 %vm220_vm0, %v218_v8  ;;  %6422 = vmatpush3.msk.msra.mxu1 %vm233_vm1, %v5717_v7  ;;  %v5966_v55 = vld [vmem:[%s8141_s1 + $0x360] sm:$0xff]  ;;  %v5758_v56 = vld [vmem:[%s8141_s1 + $0xb0] sm:$0xff]  ;;  %v5759_v57 = vld [vmem:[%s8141_s1 + $0xb8] sm:$0xff] }
  0x18   : > { %6429 = vmatprep.subr.msk.mxu1 %vm233_vm1, %v5727_v11  ;;  %6606 = vmatpush3.msk.msra.mxu0 %vm233_vm1, %v7143_v9  ;;  %v5967_v58 = vld [vmem:[%s8141_s1 + $0x368] sm:$0xff]  ;;  %v5765_v59 = vld [vmem:[%s8141_s1 + $0xc0] sm:$0xff]  ;;  %v5968_v60 = vld [vmem:[%s8141_s1 + $0x370] sm:$0xff] }
  0x19   : > { %6419 = vmatmul.mubr.msk.f32.gmra.mrb[2].mxu1 %vm220_vm0, %v219_v10  ;;  %6608 = vmatmul.mubr.msk.f32.vlgmr.msra.gmra.mrb[0].mxu0 %vm220_vm0, %v5940_v13  ;;  %v5969_v62 = vld [vmem:[%s8141_s1 + $0x378] sm:$0xff]  ;;  %v5766_v63 = vld [vmem:[%s8141_s1 + $0xc8] sm:$0xff]  ;;  %v5767_v0 = vld [vmem:[%s8141_s1 + $0xd0] sm:$0xff] }
  0x1a   : > { %774 = vrot.lane.b32.xlu1 %v5717_v7, %s7059_s24  ;;  %3316 = vrot.lane.b32.xlu0 %v215_v4, %s7060_s10  ;;  %v5975_v1 = vld [vmem:[%s8141_s1 + $0x380] sm:$0xff]  ;;  %v5976_v5 = vld [vmem:[%s8141_s1 + $0x388] sm:$0xff] }
  0x1b   : > { %6423 = vmatprep.mubr.msk.f32.mxu1 %vm220_vm0, %v5718_v12  ;;  %6615 = vmatprep.mubr.msk.f32.mxu0 %vm220_vm0, %v5948_v14  ;;  %v5977_v8 = vld [vmem:[%s8141_s1 + $0x390] sm:$0xff]  ;;  %v5776_v12 = vld [vmem:[%s8141_s1 + $0xe8] sm:$0xff]  ;;  %v5984_v14 = vld [vmem:[%s8141_s1 + $0x3a0] sm:$0xff] }
  0x1c   : > { %v5777_v13 = vld [vmem:[%s8141_s1 + $0xf0] sm:$0xff] }
  0x1d   : > { %6424 = vmatmul.mubr.msk.f32.vlgmr.msra.gmra.mrb[0].mxu1 %vm220_vm0, %v5719_v15  ;;  %v5778_v15 = vld [vmem:[%s8141_s1 + $0xf8] sm:$0xff] }
  0x1e   : > { %884 = vrot.lane.b32.xlu1 %v5727_v11, %s7059_s24  ;;  %3426 = vrot.lane.b32.xlu0 %v5717_v7, %s7060_s10 }
  0x1f   : > { %6426 = vmatprep.mubr.msk.f32.mxu1 %vm220_vm0, %v5720_v16  ;;  %6430 = vmatpush3.msk.msra.mxu1 %vm233_vm1, %v5727_v11  ;;  %v5985_v16 = vld [vmem:[%s8141_s1 + $0x3a8] sm:$0xff] }
  0x20   : > { %6437 = vmatprep.subr.msk.mxu1 %vm233_vm1, %v5737_v18 }
  0x21   : > { %6427 = vmatmul.mubr.msk.f32.gmra.mrb[2].mxu1 %vm220_vm0, %v5721_v17  ;;  %v5785_v17 = vld [vmem:[%s8141_s1 + $0x100] sm:$0xff] }
  0x22   : > { %3536 = vrot.lane.b32.xlu0 %v5727_v11, %s7060_s10  ;;  %3646 = vrot.lane.b32.xlu1 %v5737_v18, %s7060_s10 }
  0x23   : > { %6431 = vmatprep.mubr.msk.f32.mxu1 %vm220_vm0, %v5728_v19 }
  0x25   : > { %6432 = vmatmul.mubr.msk.f32.vlgmr.msra.gmra.mrb[0].mxu1 %vm220_vm0, %v5729_v20  ;;  %v5987_v20 = vld [vmem:[%s8141_s1 + $0x3b8] sm:$0xff] }
  0x26   : > { %3756 = vrot.lane.b32.xlu0 %v215_v4, %s7061_s29  ;;  %3866 = vrot.lane.b32.xlu1 %v5717_v7, %s7061_s29  ;;  %v5768_v4 = vld [vmem:[%s8141_s1 + $0xd8] sm:$0xff]  ;;  %v5775_v7 = vld [vmem:[%s8141_s1 + $0xe0] sm:$0xff] }
  0x27   : > { %6434 = vmatprep.mubr.msk.f32.mxu1 %vm220_vm0, %v5730_v21  ;;  %6438 = vmatpush3.msk.msra.mxu1 %vm233_vm1, %v5737_v18  ;;  %v5986_v18 = vld [vmem:[%s8141_s1 + $0x3b0] sm:$0xff]  ;;  %v5786_v21 = vld [vmem:[%s8141_s1 + $0x108] sm:$0xff] }
  0x29   : > { %6435 = vmatmul.mubr.msk.f32.gmra.mrb[2].mxu1 %vm220_vm0, %v5731_v22  ;;  %v5787_v22 = vld [vmem:[%s8141_s1 + $0x110] sm:$0xff] }
  0x2a   : > { %1438 = vrot.lane.b32.xlu1 %v7210_v23, %s7059_s24  ;;  %3976 = vrot.lane.b32.xlu0 %v5727_v11, %s7061_s29  ;;  %v5978_v11 = vld [vmem:[%s8141_s1 + $0x398] sm:$0xff] }
  0x2b   : > { %6439 = vmatprep.mubr.msk.f32.mxu1 %vm220_vm0, %v5738_v24  ;;  %v5788_v24 = vld [vmem:[%s8141_s1 + $0x118] sm:$0xff] }
  0x2d   : > { %6440 = vmatmul.mubr.msk.f32.vlgmr.msra.gmra.mrb[0].mxu1 %vm220_vm0, %v5739_v25  ;;  %v5994_v25 = vld [vmem:[%s8141_s1 + $0x3c8] sm:$0xff] }
  0x2e   : > { %1548 = vrot.lane.b32.xlu1 %v7225_v26, %s7059_s24  ;;  %4086 = vrot.lane.b32.xlu0 %v7210_v23, %s7060_s10 }
  0x2f   : > { %6442 = vmatprep.mubr.msk.f32.mxu1 %vm220_vm0, %v5740_v27  ;;  %v5995_v27 = vld [vmem:[%s8141_s1 + $0x3d0] sm:$0xff] }
  0x31   : > { %6443 = vmatmul.mubr.msk.f32.gmra.mrb[2].mxu1 %vm220_vm0, %v5741_v28 }
  0x32   : > { %1658 = vrot.lane.b32.xlu1 %v7240_v29, %s7059_s24  ;;  %4196 = vrot.lane.b32.xlu0 %v7225_v26, %s7060_s10 }
  0x33   : > { %6447 = vmatprep.mubr.msk.f32.mxu1 %vm220_vm0, %v5747_v30 }
  0x36   : > { %4306 = vrot.lane.b32.xlu0 %v7240_v29, %s7060_s10  ;;  %4416 = vrot.lane.b32.xlu1 %v7252_v31, %s7060_s10 }
  0x3a   : > { %4526 = vrot.lane.b32.xlu0 %v7210_v23, %s7061_s29  ;;  %4636 = vrot.lane.b32.xlu1 %v7225_v26, %s7061_s29 }
  0x3e   : > { %2212 = vrot.lane.b32.xlu1 %v7264_v32, %s7059_s24  ;;  %4746 = vrot.lane.b32.xlu0 %v7240_v29, %s7061_s29 }
  0x42   : > { %2322 = vrot.lane.b32.xlu1 %v7271_v33, %s7059_s24  ;;  %4856 = vrot.lane.b32.xlu0 %v7264_v32, %s7060_s10 }
  0x46   : > { %2432 = vrot.lane.b32.xlu1 %v7278_v34, %s7059_s24  ;;  %4966 = vrot.lane.b32.xlu0 %v7271_v33, %s7060_s10 }
  0x4a   : > { %5076 = vrot.lane.b32.xlu0 %v7278_v34, %s7060_s10  ;;  %5186 = vrot.lane.b32.xlu1 %v7285_v35, %s7060_s10 }
  0x4e   : > { %5296 = vrot.lane.b32.xlu0 %v7264_v32, %s7061_s29  ;;  %5406 = vrot.lane.b32.xlu1 %v7271_v33, %s7061_s29 }
  0x52   : > { %5516 = vrot.lane.b32.xlu0 %v7278_v34, %s7061_s29  ;;  %s190_s29 = scalar_lea.vmem %s8143_s3, %s6167_s26 }
  0x84   : > { %v3207_v36 = vpop.permute.xlu1 %3206  ;;  %v2987_v37 = vpop.permute.xlu0 %2986 }
  0x85   : > { %6613 = vmatprep.subr.msk.mxu0 %vm233_vm1, %v2987_v37 }
  0x86   : > { %6614 = vmatpush3.msk.msra.mxu0 %vm233_vm1, %v2987_v37  ;;  %v5797_v37 = vld [vmem:[%s8141_s1 + $0x130] sm:$0xff] }
  0x87   : > { %6616 = vmatmul.mubr.msk.f32.vlgmr.msra.gmra.mrb[0].mxu0 %vm220_vm0, %v5949_v38  ;;  %v6002_v38 = vld [vmem:[%s8141_s1 + $0x3e0] sm:$0xff] }
  0x88   : > { %v665_v40 = vpop.permute.xlu1 %664  ;;  %6618 = vmatprep.mubr.msk.f32.mxu0 %vm220_vm0, %v5950_v39  ;;  %v3097_v42 = vpop.permute.xlu0 %3096 }
  0x89   : > { %6445 = vmatprep.subr.msk.mxu1 %vm233_vm1, %v665_v40  ;;  %6621 = vmatprep.subr.msk.mxu0 %vm233_vm1, %v3097_v42 }
  0x8a   : > { %6446 = vmatpush3.msk.msra.mxu1 %vm233_vm1, %v665_v40  ;;  %6622 = vmatpush3.msk.msra.mxu0 %vm233_vm1, %v3097_v42  ;;  %v5798_v40 = vld [vmem:[%s8141_s1 + $0x138] sm:$0xff]  ;;  %v5805_v42 = vld [vmem:[%s8141_s1 + $0x140] sm:$0xff] }
  0x8b   : > { %6619 = vmatmul.mubr.msk.f32.gmra.mrb[2].mxu0 %vm220_vm0, %v5951_v41  ;;  %6448 = vmatmul.mubr.msk.f32.vlgmr.msra.gmra.mrb[0].mxu1 %vm220_vm0, %v5748_v43  ;;  %v6003_v41 = vld [vmem:[%s8141_s1 + $0x3e8] sm:$0xff]  ;;  %v6004_v43 = vld [vmem:[%s8141_s1 + $0x3f0] sm:$0xff] }
  0x8c   : > { %6623 = vmatprep.mubr.msk.f32.mxu0 %vm220_vm0, %v5957_v44  ;;  %6450 = vmatprep.mubr.msk.f32.mxu1 %vm220_vm0, %v5749_v45  ;;  %v775_v48 = vpop.permute.xlu1 %774  ;;  %v3317_v51 = vpop.permute.xlu0 %3316  ;;  %v6005_v44 = vld [vmem:[%s8141_s1 + $0x3f8] sm:$0xff]  ;;  %v5807_v45 = vld [vmem:[%s8141_s1 + $0x150] sm:$0xff] }
  0x8d   : > { %6453 = vmatprep.subr.msk.mxu1 %vm233_vm1, %v775_v48  ;;  %6629 = vmatprep.subr.msk.mxu0 %vm233_vm1, %v3207_v36 }
  0x8e   : > { %6454 = vmatpush3.msk.msra.mxu1 %vm233_vm1, %v775_v48  ;;  %v5808_v48 = vld [vmem:[%s8141_s1 + $0x158] sm:$0xff] }
  0x8f   : > { %6451 = vmatmul.mubr.msk.f32.gmra.mrb[2].mxu1 %vm220_vm0, %v5750_v46  ;;  %6624 = vmatmul.mubr.msk.f32.vlgmr.msra.gmra.mrb[0].mxu0 %vm220_vm0, %v5958_v47  ;;  %v6011_v46 = vld [vmem:[%s8141_s1 + $0x400] sm:$0xff] }
  0x90   : > { %6455 = vmatprep.mubr.msk.f32.mxu1 %vm220_vm0, %v5756_v49  ;;  %6626 = vmatprep.mubr.msk.f32.mxu0 %vm220_vm0, %v5959_v50  ;;  %v885_v54 = vpop.permute.xlu1 %884  ;;  %v3427_v61 = vpop.permute.xlu0 %3426  ;;  %v6012_v49 = vld [vmem:[%s8141_s1 + $0x408] sm:$0xff]  ;;  %v5814_v50 = vld [vmem:[%s8141_s1 + $0x160] sm:$0xff] }
  0x91   : > { %6630 = vmatpush3.msk.msra.mxu0 %vm233_vm1, %v3207_v36  ;;  %6461 = vmatprep.subr.msk.mxu1 %vm233_vm1, %v885_v54  ;;  %v5796_v36 = vld [vmem:[%s8141_s1 + $0x128] sm:$0xff] }
  0x92   : > { %6637 = vmatprep.subr.msk.mxu0 %vm233_vm1, %v3317_v51 }
  0x93   : > { %6456 = vmatmul.mubr.msk.f32.vlgmr.msra.gmra.mrb[0].mxu1 %vm220_vm0, %v5757_v52  ;;  %6627 = vmatmul.mubr.msk.f32.gmra.mrb[2].mxu0 %vm220_vm0, %v5960_v53  ;;  %v5815_v53 = vld [vmem:[%s8141_s1 + $0x168] sm:$0xff] }
  0x94   : > { %6631 = vmatprep.mubr.msk.f32.mxu0 %vm220_vm0, %v5966_v55  ;;  %6458 = vmatprep.mubr.msk.f32.mxu1 %vm220_vm0, %v5758_v56  ;;  %v3537_v10 = vpop.permute.xlu0 %3536  ;;  %v3647_v19 = vpop.permute.xlu1 %3646  ;;  %v5816_v55 = vld [vmem:[%s8141_s1 + $0x170] sm:$0xff]  ;;  %v6020_v56 = vld [vmem:[%s8141_s1 + $0x420] sm:$0xff] }
  0x95   : > { %6462 = vmatpush3.msk.msra.mxu1 %vm233_vm1, %v885_v54  ;;  %v6014_v54 = vld [vmem:[%s8141_s1 + $0x418] sm:$0xff] }
  0x96   : > { %6469 = vmatprep.subr.msk.mxu1 %vm233_vm1, %v7210_v23 }
  0x97   : > { %6459 = vmatmul.mubr.msk.f32.gmra.mrb[2].mxu1 %vm220_vm0, %v5759_v57  ;;  %6632 = vmatmul.mubr.msk.f32.vlgmr.msra.gmra.mrb[0].mxu0 %vm220_vm0, %v5967_v58  ;;  %v5817_v58 = vld [vmem:[%s8141_s1 + $0x178] sm:$0xff] }
  0x98   : > { %6463 = vmatprep.mubr.msk.f32.mxu1 %vm220_vm0, %v5765_v59  ;;  %6634 = vmatprep.mubr.msk.f32.mxu0 %vm220_vm0, %v5968_v60  ;;  %v3867_v28 = vpop.permute.xlu1 %3866  ;;  %v3757_v30 = vpop.permute.xlu0 %3756  ;;  %v6021_v59 = vld [vmem:[%s8141_s1 + $0x428] sm:$0xff]  ;;  %v5823_v60 = vld [vmem:[%s8141_s1 + $0x180] sm:$0xff] }
  0x99   : > { %6638 = vmatpush3.msk.msra.mxu0 %vm233_vm1, %v3317_v51  ;;  %v6013_v51 = vld [vmem:[%s8141_s1 + $0x410] sm:$0xff] }
  0x9a   : > { %6645 = vmatprep.subr.msk.mxu0 %vm233_vm1, %v3427_v61 }
  0x9b   : > { %6635 = vmatmul.mubr.msk.f32.gmra.mrb[2].mxu0 %vm220_vm0, %v5969_v62  ;;  %6464 = vmatmul.mubr.msk.f32.vlgmr.msra.gmra.mrb[0].mxu1 %vm220_vm0, %v5766_v63  ;;  %v7062_v62 = vmov 0   ;;  %v192_v63 = vld [vmem:[%s8142_s2 + $0x8] sm:$0xff] }
  0x9c   : > { %6466 = vmatprep.mubr.msk.f32.mxu1 %vm220_vm0, %v5767_v0  ;;  %6639 = vmatprep.mubr.msk.f32.mxu0 %vm220_vm0, %v5975_v1  ;;  %v1439_v39 = vpop.permute.xlu1 %1438  ;;  %v3977_v52 = vpop.permute.xlu0 %3976  ;;  %v191_v1 = vld [vmem:[%s8142_s2] sm:$0xff] }
  0x9d   : > { %6470 = vmatpush3.msk.msra.mxu1 %vm233_vm1, %v7210_v23  ;;  %v5993_v23 = vld [vmem:[%s8141_s1 + $0x3c0] sm:$0xff]  ;;  %7032 = vset.pattern.permute.xlu0 %v7062_v62 }
  0x9e   : > { %6477 = vmatprep.subr.msk.mxu1 %vm233_vm1, %v7225_v26  ;;  %7031 = vset.pattern.permute.xlu1 %v7062_v62  ;;  %v6076_v62 = vld [vmem:[%s8141_s1 + $0x4f0] sm:$0xff] }
  0x9f   : > { %6467 = vmatmul.mubr.msk.f32.gmra.mrb[2].mxu1 %vm220_vm0, %v5768_v4  ;;  %6640 = vmatmul.mubr.msk.f32.vlgmr.msra.gmra.mrb[0].mxu0 %vm220_vm0, %v5976_v5  ;;  %v5824_v4 = vld [vmem:[%s8141_s1 + $0x188] sm:$0xff]  ;;  %v6023_v5 = vld [vmem:[%s8141_s1 + $0x438] sm:$0xff] }
  0xa0   : > { %6471 = vmatprep.mubr.msk.f32.mxu1 %vm220_vm0, %v5775_v7  ;;  %6642 = vmatprep.mubr.msk.f32.mxu0 %vm220_vm0, %v5977_v8  ;;  %v1549_v47 = vpop.permute.xlu1 %1548  ;;  %v4087_v0 = vpop.permute.xlu0 %4086  ;;  %v5825_v7 = vld [vmem:[%s8141_s1 + $0x190] sm:$0xff]  ;;  %v6029_v8 = vld [vmem:[%s8141_s1 + $0x440] sm:$0xff] }
  0xa1   : > { %6646 = vmatpush3.msk.msra.mxu0 %vm233_vm1, %v3427_v61  ;;  %v6022_v61 = vld [vmem:[%s8141_s1 + $0x430] sm:$0xff]  ;;  %202 = vperm.xlu0 %7032, %v192_v63  }
  0xa2   : > { %6653 = vmatprep.subr.msk.mxu0 %vm233_vm1, %v3537_v10  ;;  %197 = vperm.xlu1 %7031, %v191_v1   ;;  %v6077_v1 = vld [vmem:[%s8141_s1 + $0x4f8] sm:$0xff] }
  0xa3   : > { %6643 = vmatmul.mubr.msk.f32.gmra.mrb[2].mxu0 %vm220_vm0, %v5978_v11  ;;  %6472 = vmatmul.mubr.msk.f32.vlgmr.msra.gmra.mrb[0].mxu1 %vm220_vm0, %v5776_v12  ;;  %v5826_v11 = vld [vmem:[%s8141_s1 + $0x198] sm:$0xff]  ;;  %v6030_v12 = vld [vmem:[%s8141_s1 + $0x448] sm:$0xff] }
  0xa4   : > { %6474 = vmatprep.mubr.msk.f32.mxu1 %vm220_vm0, %v5777_v13  ;;  %6647 = vmatprep.mubr.msk.f32.mxu0 %vm220_vm0, %v5984_v14  ;;  %v1659_v57 = vpop.permute.xlu1 %1658  ;;  %v5832_v13 = vld [vmem:[%s8141_s1 + $0x1a0] sm:$0xff]  ;;  %v6031_v14 = vld [vmem:[%s8141_s1 + $0x450] sm:$0xff] }
  0xa5   : > { %6478 = vmatpush3.msk.msra.mxu1 %vm233_vm1, %v7225_v26  ;;  %v5795_v26 = vld [vmem:[%s8141_s1 + $0x120] sm:$0xff] }
  0xa6   : > { %6485 = vmatprep.subr.msk.mxu1 %vm233_vm1, %v7240_v29 }
  0xa7   : > { %6475 = vmatmul.mubr.msk.f32.gmra.mrb[2].mxu1 %vm220_vm0, %v5778_v15  ;;  %6648 = vmatmul.mubr.msk.f32.vlgmr.msra.gmra.mrb[0].mxu0 %vm220_vm0, %v5985_v16  ;;  %v4197_v15 = vpop.permute.xlu0 %4196  ;;  %v194_v16 = vld [vmem:[%s8142_s2 + $0x18] sm:$0xff] }
  0xa8   : > { %6479 = vmatprep.mubr.msk.f32.mxu1 %vm220_vm0, %v5785_v17  ;;  %6650 = vmatprep.mubr.msk.f32.mxu0 %vm220_vm0, %v5986_v18  ;;  %v5833_v17 = vld [vmem:[%s8141_s1 + $0x1a8] sm:$0xff]  ;;  %v6032_v18 = vld [vmem:[%s8141_s1 + $0x458] sm:$0xff] }
  0xa9   : > { %6654 = vmatpush3.msk.msra.mxu0 %vm233_vm1, %v3537_v10  ;;  %v193_v10 = vld [vmem:[%s8142_s2 + $0x10] sm:$0xff] }
  0xaa   : > { %6661 = vmatprep.subr.msk.mxu0 %vm233_vm1, %v3647_v19  ;;  %207 = vperm.xlu1 %7031, %v193_v10   ;;  %v6084_v10 = vld [vmem:[%s8141_s1 + $0x508] sm:$0xff] }
  0xab   : > { %6651 = vmatmul.mubr.msk.f32.gmra.mrb[2].mxu0 %vm220_vm0, %v5987_v20  ;;  %6480 = vmatmul.mubr.msk.f32.vlgmr.msra.gmra.mrb[0].mxu1 %vm220_vm0, %v5786_v21  ;;  %v6038_v20 = vld [vmem:[%s8141_s1 + $0x460] sm:$0xff]  ;;  %v5835_v21 = vld [vmem:[%s8141_s1 + $0x1b8] sm:$0xff] }
  0xac   : > { %6482 = vmatprep.mubr.msk.f32.mxu1 %vm220_vm0, %v5787_v22  ;;  %6655 = vmatprep.mubr.msk.f32.mxu0 %vm220_vm0, %v5993_v23  ;;  %v6039_v22 = vld [vmem:[%s8141_s1 + $0x468] sm:$0xff]  ;;  %v5842_v23 = vld [vmem:[%s8141_s1 + $0x1c0] sm:$0xff] }
  0xad   : > { %6486 = vmatpush3.msk.msra.mxu1 %vm233_vm1, %v7240_v29  ;;  %v5996_v29 = vld [vmem:[%s8141_s1 + $0x3d8] sm:$0xff] }
  0xae   : > { %6493 = vmatprep.subr.msk.mxu1 %vm233_vm1, %v7252_v31  ;;  %212 = vperm.xlu1 %7031, %v194_v16   ;;  %v5892_v16 = vld [vmem:[%s8141_s1 + $0x270] sm:$0xff] }
  0xaf   : > { %6483 = vmatmul.mubr.msk.f32.gmra.mrb[2].mxu1 %vm220_vm0, %v5788_v24  ;;  %6656 = vmatmul.mubr.msk.f32.vlgmr.msra.gmra.mrb[0].mxu0 %vm220_vm0, %v5994_v25  ;;  %v6040_v24 = vld [vmem:[%s8141_s1 + $0x470] sm:$0xff]  ;;  %v4307_v25 = vpop.permute.xlu0 %4306 }
  0xb0   : > { %6487 = vmatprep.mubr.msk.f32.mxu1 %vm220_vm0, %v5795_v26  ;;  %6658 = vmatprep.mubr.msk.f32.mxu0 %vm220_vm0, %v5995_v27  ;;  %v6041_v26 = vld [vmem:[%s8141_s1 + $0x478] sm:$0xff]  ;;  %v5844_v27 = vld [vmem:[%s8141_s1 + $0x1d0] sm:$0xff] }
  0xb1   : > { %6662 = vmatpush3.msk.msra.mxu0 %vm233_vm1, %v3647_v19  ;;  %v5834_v19 = vld [vmem:[%s8141_s1 + $0x1b0] sm:$0xff] }
  0xb2   : > { %6669 = vmatprep.subr.msk.mxu0 %vm233_vm1, %v3757_v30 }
  0xb3   : > { %6659 = vmatmul.mubr.msk.f32.gmra.mrb[2].mxu0 %vm220_vm0, %v5996_v29  ;;  %6488 = vmatmul.mubr.msk.f32.vlgmr.msra.gmra.mrb[0].mxu1 %vm220_vm0, %v5796_v36  ;;  %v6048_v29 = vld [vmem:[%s8141_s1 + $0x488] sm:$0xff]  ;;  %v5852_v36 = vld [vmem:[%s8141_s1 + $0x1e0] sm:$0xff] }
  0xb4   : > { %6490 = vmatprep.mubr.msk.f32.mxu1 %vm220_vm0, %v5797_v37  ;;  %6663 = vmatprep.mubr.msk.f32.mxu0 %vm220_vm0, %v6002_v38  ;;  %v6049_v37 = vld [vmem:[%s8141_s1 + $0x490] sm:$0xff]  ;;  %v4417_v38 = vpop.permute.xlu1 %4416 }
  0xb5   : > { %6494 = vmatpush3.msk.msra.mxu1 %vm233_vm1, %v7252_v31  ;;  %v5806_v31 = vld [vmem:[%s8141_s1 + $0x148] sm:$0xff] }
  0xb6   : > { %6501 = vmatprep.subr.msk.mxu1 %vm233_vm1, %v1439_v39 }
  0xb7   : > { %6491 = vmatmul.mubr.msk.f32.gmra.mrb[2].mxu1 %vm220_vm0, %v5798_v40  ;;  %6664 = vmatmul.mubr.msk.f32.vlgmr.msra.gmra.mrb[0].mxu0 %vm220_vm0, %v6003_v41  ;;  %v5854_v40 = vld [vmem:[%s8141_s1 + $0x1f0] sm:$0xff]  ;;  %v6056_v41 = vld [vmem:[%s8141_s1 + $0x4a0] sm:$0xff] }
  0xb8   : > { %6495 = vmatprep.mubr.msk.f32.mxu1 %vm220_vm0, %v5805_v42  ;;  %6666 = vmatprep.mubr.msk.f32.mxu0 %vm220_vm0, %v6004_v43  ;;  %v5855_v42 = vld [vmem:[%s8141_s1 + $0x1f8] sm:$0xff]  ;;  %v6057_v43 = vld [vmem:[%s8141_s1 + $0x4a8] sm:$0xff] }
  0xb9   : > { %6670 = vmatpush3.msk.msra.mxu0 %vm233_vm1, %v3757_v30  ;;  %v5845_v30 = vld [vmem:[%s8141_s1 + $0x1d8] sm:$0xff] }
  0xba   : > { %6677 = vmatprep.subr.msk.mxu0 %vm233_vm1, %v3867_v28 }
  0xbb   : > { %6496 = vmatmul.mubr.msk.f32.vlgmr.msra.gmra.mrb[0].mxu1 %vm220_vm0, %v5806_v31  ;;  %6667 = vmatmul.mubr.msk.f32.gmra.mrb[2].mxu0 %vm220_vm0, %v6005_v44  ;;  %v5862_v31 = vld [vmem:[%s8141_s1 + $0x200] sm:$0xff]  ;;  %v6058_v44 = vld [vmem:[%s8141_s1 + $0x4b0] sm:$0xff] }
  0xbc   : > { %6498 = vmatprep.mubr.msk.f32.mxu1 %vm220_vm0, %v5807_v45  ;;  %6671 = vmatprep.mubr.msk.f32.mxu0 %vm220_vm0, %v6011_v46  ;;  %v4637_v45 = vpop.permute.xlu1 %4636  ;;  %v4527_v46 = vpop.permute.xlu0 %4526 }
  0xbd   : > { %6502 = vmatpush3.msk.msra.mxu1 %vm233_vm1, %v1439_v39  ;;  %v6050_v39 = vld [vmem:[%s8141_s1 + $0x498] sm:$0xff] }
  0xbe   : > { %6509 = vmatprep.subr.msk.mxu1 %vm233_vm1, %v1549_v47 }
  0xbf   : > { %6499 = vmatmul.mubr.msk.f32.gmra.mrb[2].mxu1 %vm220_vm0, %v5808_v48  ;;  %6672 = vmatmul.mubr.msk.f32.vlgmr.msra.gmra.mrb[0].mxu0 %vm220_vm0, %v6012_v49  ;;  %v5864_v48 = vld [vmem:[%s8141_s1 + $0x210] sm:$0xff]  ;;  %v6065_v49 = vld [vmem:[%s8141_s1 + $0x4c0] sm:$0xff] }
  0xc0   : > { %6503 = vmatprep.mubr.msk.f32.mxu1 %vm220_vm0, %v5814_v50  ;;  %6674 = vmatprep.mubr.msk.f32.mxu0 %vm220_vm0, %v6013_v51  ;;  %v2213_v50 = vpop.permute.xlu1 %2212  ;;  %v5865_v51 = vld [vmem:[%s8141_s1 + $0x218] sm:$0xff]  ;;  %v4747_v63 = vpop.permute.xlu0 %4746 }
  0xc1   : > { %6678 = vmatpush3.msk.msra.mxu0 %vm233_vm1, %v3867_v28  ;;  %v6047_v28 = vld [vmem:[%s8141_s1 + $0x480] sm:$0xff] }
  0xc2   : > { %6685 = vmatprep.subr.msk.mxu0 %vm233_vm1, %v3977_v52 }
  0xc3   : > { %6504 = vmatmul.mubr.msk.f32.vlgmr.msra.gmra.mrb[0].mxu1 %vm220_vm0, %v5815_v53  ;;  %6675 = vmatmul.mubr.msk.f32.gmra.mrb[2].mxu0 %vm220_vm0, %v6014_v54  ;;  %v5872_v53 = vld [vmem:[%s8141_s1 + $0x220] sm:$0xff]  ;;  %v6067_v54 = vld [vmem:[%s8141_s1 + $0x4d0] sm:$0xff] }
  0xc4   : > { %6506 = vmatprep.mubr.msk.f32.mxu1 %vm220_vm0, %v5816_v55  ;;  %6679 = vmatprep.mubr.msk.f32.mxu0 %vm220_vm0, %v6020_v56  ;;  %v6068_v55 = vld [vmem:[%s8141_s1 + $0x4d8] sm:$0xff]  ;;  %v5874_v56 = vld [vmem:[%s8141_s1 + $0x230] sm:$0xff] }
  0xc5   : > { %6510 = vmatpush3.msk.msra.mxu1 %vm233_vm1, %v1549_v47  ;;  %v5863_v47 = vld [vmem:[%s8141_s1 + $0x208] sm:$0xff] }
  0xc6   : > { %6517 = vmatprep.subr.msk.mxu1 %vm233_vm1, %v1659_v57 }
  0xc7   : > { %6507 = vmatmul.mubr.msk.f32.gmra.mrb[2].mxu1 %vm220_vm0, %v5817_v58  ;;  %6680 = vmatmul.mubr.msk.f32.vlgmr.msra.gmra.mrb[0].mxu0 %vm220_vm0, %v6021_v59  ;;  %v2323_v58 = vpop.permute.xlu1 %2322  ;;  %v5875_v59 = vld [vmem:[%s8141_s1 + $0x238] sm:$0xff] }
  0xc8   : > { %6511 = vmatprep.mubr.msk.f32.mxu1 %vm220_vm0, %v5823_v60  ;;  %6682 = vmatprep.mubr.msk.f32.mxu0 %vm220_vm0, %v6022_v61  ;;  %v6075_v60 = vld [vmem:[%s8141_s1 + $0x4e8] sm:$0xff]  ;;  %v5881_v61 = vld [vmem:[%s8141_s1 + $0x240] sm:$0xff] }
  0xc9   : > { %6686 = vmatpush3.msk.msra.mxu0 %vm233_vm1, %v3977_v52  ;;  %v6066_v52 = vld [vmem:[%s8141_s1 + $0x4c8] sm:$0xff] }
  0xca   : > { %6693 = vmatprep.subr.msk.mxu0 %vm233_vm1, %v4087_v0 }
  0xcb   : > { %6512 = vmatmul.mubr.msk.f32.vlgmr.msra.gmra.mrb[0].mxu1 %vm220_vm0, %v5824_v4  ;;  %6683 = vmatmul.mubr.msk.f32.gmra.mrb[2].mxu0 %vm220_vm0, %v6023_v5  ;;  %v5883_v4 = vld [vmem:[%s8141_s1 + $0x250] sm:$0xff]  ;;  %v6083_v5 = vld [vmem:[%s8141_s1 + $0x500] sm:$0xff] }
  0xcc   : > { %6514 = vmatprep.mubr.msk.f32.mxu1 %vm220_vm0, %v5825_v7  ;;  %6687 = vmatprep.mubr.msk.f32.mxu0 %vm220_vm0, %v6029_v8  ;;  %v2433_v7 = vpop.permute.xlu1 %2432  ;;  %v5884_v8 = vld [vmem:[%s8141_s1 + $0x258] sm:$0xff] }
  0xcd   : > { %6518 = vmatpush3.msk.msra.mxu1 %vm233_vm1, %v1659_v57  ;;  %v6074_v57 = vld [vmem:[%s8141_s1 + $0x4e0] sm:$0xff] }
  0xce   : > { %6525 = vmatprep.subr.msk.mxu1 %vm233_vm1, %v7264_v32 }
  0xcf   : > { %6515 = vmatmul.mubr.msk.f32.gmra.mrb[2].mxu1 %vm220_vm0, %v5826_v11  ;;  %6688 = vmatmul.mubr.msk.f32.vlgmr.msra.gmra.mrb[0].mxu0 %vm220_vm0, %v6030_v12  ;;  %v5890_v11 = vld [vmem:[%s8141_s1 + $0x260] sm:$0xff]  ;;  %v6085_v12 = vld [vmem:[%s8141_s1 + $0x510] sm:$0xff] }
  0xd0   : > { %6519 = vmatprep.mubr.msk.f32.mxu1 %vm220_vm0, %v5832_v13  ;;  %6690 = vmatprep.mubr.msk.f32.mxu0 %vm220_vm0, %v6031_v14  ;;  %v4857_v13 = vpop.permute.xlu0 %4856  ;;  %v5891_v14 = vld [vmem:[%s8141_s1 + $0x268] sm:$0xff] }
  0xd1   : > { %6694 = vmatpush3.msk.msra.mxu0 %vm233_vm1, %v4087_v0  ;;  %v5882_v0 = vld [vmem:[%s8141_s1 + $0x248] sm:$0xff] }
  0xd2   : > { %6701 = vmatprep.subr.msk.mxu0 %vm233_vm1, %v4197_v15 }
  0xd3   : > { %6520 = vmatmul.mubr.msk.f32.vlgmr.msra.gmra.mrb[0].mxu1 %vm220_vm0, %v5833_v17  ;;  %6691 = vmatmul.mubr.msk.f32.gmra.mrb[2].mxu0 %vm220_vm0, %v6032_v18  ;;  %v6092_v17 = vld [vmem:[%s8141_s1 + $0x520] sm:$0xff]  ;;  %v5893_v18 = vld [vmem:[%s8141_s1 + $0x278] sm:$0xff] }
  0xd4   : > { %6522 = vmatprep.mubr.msk.f32.mxu1 %vm220_vm0, %v5834_v19  ;;  %6695 = vmatprep.mubr.msk.f32.mxu0 %vm220_vm0, %v6038_v20  ;;  %v6093_v19 = vld [vmem:[%s8141_s1 + $0x528] sm:$0xff]  ;;  %v5899_v20 = vld [vmem:[%s8141_s1 + $0x280] sm:$0xff] }
  0xd5   : > { %6526 = vmatpush3.msk.msra.mxu1 %vm233_vm1, %v7264_v32  ;;  %v5843_v32 = vld [vmem:[%s8141_s1 + $0x1c8] sm:$0xff] }
  0xd6   : > { %6533 = vmatprep.subr.msk.mxu1 %vm233_vm1, %v7271_v33 }
  0xd7   : > { %6523 = vmatmul.mubr.msk.f32.gmra.mrb[2].mxu1 %vm220_vm0, %v5835_v21  ;;  %6696 = vmatmul.mubr.msk.f32.vlgmr.msra.gmra.mrb[0].mxu0 %vm220_vm0, %v6039_v22  ;;  %v6094_v21 = vld [vmem:[%s8141_s1 + $0x530] sm:$0xff]  ;;  %v4967_v22 = vpop.permute.xlu0 %4966 }
  0xd8   : > { %6527 = vmatprep.mubr.msk.f32.mxu1 %vm220_vm0, %v5842_v23  ;;  %6698 = vmatprep.mubr.msk.f32.mxu0 %vm220_vm0, %v6040_v24  ;;  %v5900_v23 = vld [vmem:[%s8141_s1 + $0x288] sm:$0xff]  ;;  %v6095_v24 = vld [vmem:[%s8141_s1 + $0x538] sm:$0xff] }
  0xd9   : > { %6702 = vmatpush3.msk.msra.mxu0 %vm233_vm1, %v4197_v15  ;;  %v6086_v15 = vld [vmem:[%s8141_s1 + $0x518] sm:$0xff] }
  0xda   : > { %6709 = vmatprep.subr.msk.mxu0 %vm233_vm1, %v4307_v25 }
  0xdb   : > { %6528 = vmatmul.mubr.msk.f32.vlgmr.msra.gmra.mrb[0].mxu1 %vm220_vm0, %v5843_v32  ;;  %6699 = vmatmul.mubr.msk.f32.gmra.mrb[2].mxu0 %vm220_vm0, %v6041_v26  ;;  %v6101_v32 = vld [vmem:[%s8141_s1 + $0x540] sm:$0xff]  ;;  %v5902_v26 = vld [vmem:[%s8141_s1 + $0x298] sm:$0xff] }
  0xdc   : > { %6530 = vmatprep.mubr.msk.f32.mxu1 %vm220_vm0, %v5844_v27  ;;  %6703 = vmatprep.mubr.msk.f32.mxu0 %vm220_vm0, %v6047_v28  ;;  %v6102_v27 = vld [vmem:[%s8141_s1 + $0x548] sm:$0xff]  ;;  %v5909_v28 = vld [vmem:[%s8141_s1 + $0x2a0] sm:$0xff] }
  0xdd   : > { %6534 = vmatpush3.msk.msra.mxu1 %vm233_vm1, %v7271_v33  ;;  %v5853_v33 = vld [vmem:[%s8141_s1 + $0x1e8] sm:$0xff] }
  0xde   : > { %6541 = vmatprep.subr.msk.mxu1 %vm233_vm1, %v7278_v34 }
  0xdf   : > { %6531 = vmatmul.mubr.msk.f32.gmra.mrb[2].mxu1 %vm220_vm0, %v5845_v30  ;;  %6704 = vmatmul.mubr.msk.f32.vlgmr.msra.gmra.mrb[0].mxu0 %vm220_vm0, %v6048_v29  ;;  %v6103_v30 = vld [vmem:[%s8141_s1 + $0x550] sm:$0xff]  ;;  %v5077_v29 = vpop.permute.xlu0 %5076 }
  0xe0   : > { %6535 = vmatprep.mubr.msk.f32.mxu1 %vm220_vm0, %v5852_v36  ;;  %6706 = vmatprep.mubr.msk.f32.mxu0 %vm220_vm0, %v6049_v37  ;;  %v6104_v36 = vld [vmem:[%s8141_s1 + $0x558] sm:$0xff]  ;;  %v5911_v37 = vld [vmem:[%s8141_s1 + $0x2b0] sm:$0xff] }
  0xe1   : > { %6710 = vmatpush3.msk.msra.mxu0 %vm233_vm1, %v4307_v25  ;;  %v5901_v25 = vld [vmem:[%s8141_s1 + $0x290] sm:$0xff] }
  0xe2   : > { %6717 = vmatprep.subr.msk.mxu0 %vm233_vm1, %v4417_v38 }
  0xe3   : > { %6536 = vmatmul.mubr.msk.f32.vlgmr.msra.gmra.mrb[0].mxu1 %vm220_vm0, %v5853_v33  ;;  %6707 = vmatmul.mubr.msk.f32.gmra.mrb[2].mxu0 %vm220_vm0, %v6050_v39  ;;  %v5912_v33 = vld [vmem:[%s8141_s1 + $0x2b8] sm:$0xff]  ;;  %v6111_v39 = vld [vmem:[%s8141_s1 + $0x568] sm:$0xff] }
  0xe4   : > { %6538 = vmatprep.mubr.msk.f32.mxu1 %vm220_vm0, %v5854_v40  ;;  %6711 = vmatprep.mubr.msk.f32.mxu0 %vm220_vm0, %v6056_v41  ;;  %v5919_v40 = vld [vmem:[%s8141_s1 + $0x2c0] sm:$0xff]  ;;  %v6112_v41 = vld [vmem:[%s8141_s1 + $0x570] sm:$0xff] }
  0xe5   : > { %6542 = vmatpush3.msk.msra.mxu1 %vm233_vm1, %v7278_v34  ;;  %v6059_v34 = vld [vmem:[%s8141_s1 + $0x4b8] sm:$0xff] }
  0xe6   : > { %6549 = vmatprep.subr.msk.mxu1 %vm233_vm1, %v7285_v35 }
  0xe7   : > { %6539 = vmatmul.mubr.msk.f32.gmra.mrb[2].mxu1 %vm220_vm0, %v5855_v42  ;;  %6712 = vmatmul.mubr.msk.f32.vlgmr.msra.gmra.mrb[0].mxu0 %vm220_vm0, %v6057_v43  ;;  %v5187_v42 = vpop.permute.xlu1 %5186  ;;  %v6113_v43 = vld [vmem:[%s8141_s1 + $0x578] sm:$0xff] }
  0xe8   : > { %6543 = vmatprep.mubr.msk.f32.mxu1 %vm220_vm0, %v5862_v31  ;;  %6714 = vmatprep.mubr.msk.f32.mxu0 %vm220_vm0, %v6058_v44  ;;  %v6119_v31 = vld [vmem:[%s8141_s1 + $0x580] sm:$0xff]  ;;  %v5922_v44 = vld [vmem:[%s8141_s1 + $0x2d8] sm:$0xff] }
  0xe9   : > { %6718 = vmatpush3.msk.msra.mxu0 %vm233_vm1, %v4417_v38  ;;  %v6110_v38 = vld [vmem:[%s8141_s1 + $0x560] sm:$0xff] }
  0xea   : > { %6725 = vmatprep.subr.msk.mxu0 %vm233_vm1, %v4527_v46 }
  0xeb   : > { %6715 = vmatmul.mubr.msk.f32.gmra.mrb[2].mxu0 %vm220_vm0, %v6059_v34  ;;  %6544 = vmatmul.mubr.msk.f32.vlgmr.msra.gmra.mrb[0].mxu1 %vm220_vm0, %v5863_v47  ;;  %v5929_v34 = vld [vmem:[%s8141_s1 + $0x2e0] sm:$0xff]  ;;  %v6121_v47 = vld [vmem:[%s8141_s1 + $0x590] sm:$0xff] }
  0xec   : > { %6546 = vmatprep.mubr.msk.f32.mxu1 %vm220_vm0, %v5864_v48  ;;  %6719 = vmatprep.mubr.msk.f32.mxu0 %vm220_vm0, %v6065_v49  ;;  %v5297_v48 = vpop.permute.xlu0 %5296  ;;  %v6122_v49 = vld [vmem:[%s8141_s1 + $0x598] sm:$0xff] }
  0xed   : > { %6550 = vmatpush3.msk.msra.mxu1 %vm233_vm1, %v7285_v35  ;;  %v5873_v35 = vld [vmem:[%s8141_s1 + $0x228] sm:$0xff] }
  0xee   : > { %6557 = vmatprep.subr.msk.mxu1 %vm233_vm1, %v2213_v50 }
  0xef   : > { %6547 = vmatmul.mubr.msk.f32.gmra.mrb[2].mxu1 %vm220_vm0, %v5865_v51  ;;  %6720 = vmatmul.mubr.msk.f32.vlgmr.msra.gmra.mrb[0].mxu0 %vm220_vm0, %v6066_v52  ;;  %v6128_v51 = vld [vmem:[%s8141_s1 + $0x5a0] sm:$0xff]  ;;  %v5932_v52 = vld [vmem:[%s8141_s1 + $0x2f8] sm:$0xff] }
  0xf0   : > { %6551 = vmatprep.mubr.msk.f32.mxu1 %vm220_vm0, %v5872_v53  ;;  %6722 = vmatprep.mubr.msk.f32.mxu0 %vm220_vm0, %v6067_v54  ;;  %v6129_v53 = vld [vmem:[%s8141_s1 + $0x5a8] sm:$0xff]  ;;  %v6130_v54 = vld [vmem:[%s8141_s1 + $0x5b0] sm:$0xff] }
  0xf1   : > { %6726 = vmatpush3.msk.msra.mxu0 %vm233_vm1, %v4527_v46  ;;  %v7033_v46 = vld [vmem:[%s7114_s23 + $0x38] sm:$0xf] }
  0xf2   : > { %6733 = vmatprep.subr.msk.mxu0 %vm233_vm1, %v4637_v45 }
  0xf3   : > { %6552 = vmatmul.mubr.msk.f32.vlgmr.msra.gmra.mrb[0].mxu1 %vm220_vm0, %v5873_v35  ;;  %6723 = vmatmul.mubr.msk.f32.gmra.mrb[2].mxu0 %vm220_vm0, %v6068_v55  ;;  %v7034_v35 = vld [vmem:[%s7114_s23 + $0x3c] sm:$0xf]  ;;  %v5941_v55 = vld [vmem:[%s8141_s1 + $0x310] sm:$0xff] }
  0xf4   : > { %6554 = vmatprep.mubr.msk.f32.mxu1 %vm220_vm0, %v5874_v56  ;;  %6727 = vmatprep.mubr.msk.f32.mxu0 %vm220_vm0, %v6074_v57  ;;  %v5407_v56 = vpop.permute.xlu1 %5406  ;;  %v6131_v57 = vld [vmem:[%s8141_s1 + $0x5b8] sm:$0xff] }
  0xf5   : > { %6558 = vmatpush3.msk.msra.mxu1 %vm233_vm1, %v2213_v50  ;;  %v5930_v50 = vld [vmem:[%s8141_s1 + $0x2e8] sm:$0xff] }
  0xf6   : > { %6565 = vmatprep.subr.msk.mxu1 %vm233_vm1, %v2323_v58 }
  0xf7   : > { %6555 = vmatmul.mubr.msk.f32.gmra.mrb[2].mxu1 %vm220_vm0, %v5875_v59  ;;  %6728 = vmatmul.mubr.msk.f32.vlgmr.msra.gmra.mrb[0].mxu0 %vm220_vm0, %v6075_v60  ;;  %v5942_v59 = vld [vmem:[%s8141_s1 + $0x318] sm:$0xff]  ;;  %v6138_v60 = vld [vmem:[%s8141_s1 + $0x5c8] sm:$0xff] }
  0xf8   : > { %6559 = vmatprep.mubr.msk.f32.mxu1 %vm220_vm0, %v5881_v61  ;;  %6730 = vmatprep.mubr.msk.f32.mxu0 %vm220_vm0, %v6076_v62  ;;  %v6139_v61 = vld [vmem:[%s8141_s1 + $0x5d0] sm:$0xff]  ;;  %v5517_v62 = vpop.permute.xlu0 %5516 }
  0xf9   : > { %6734 = vmatpush3.msk.msra.mxu0 %vm233_vm1, %v4637_v45  ;;  %v6120_v45 = vld [vmem:[%s8141_s1 + $0x588] sm:$0xff] }
  0xfa   : > { %6741 = vmatprep.subr.msk.mxu0 %vm233_vm1, %v4747_v63 }
  0xfb   : > { %6560 = vmatmul.mubr.msk.f32.vlgmr.msra.gmra.mrb[0].mxu1 %vm220_vm0, %v5882_v0  ;;  %6731 = vmatmul.mubr.msk.f32.gmra.mrb[2].mxu0 %vm220_vm0, %v6077_v1  ;;  %v6146_v0 = vld [vmem:[%s8141_s1 + $0x5e0] sm:$0xff]  ;;  %v6147_v1 = vld [vmem:[%s8141_s1 + $0x5e8] sm:$0xff] }
  0xfc   : > { %6562 = vmatprep.mubr.msk.f32.mxu1 %vm220_vm0, %v5883_v4  ;;  %6735 = vmatprep.mubr.msk.f32.mxu0 %vm220_vm0, %v6083_v5  ;;  %v6148_v4 = vld [vmem:[%s8141_s1 + $0x5f0] sm:$0xff]  ;;  %v6149_v5 = vld [vmem:[%s8141_s1 + $0x5f8] sm:$0xff] }
  0xfd   : > { %6566 = vmatpush3.msk.msra.mxu1 %vm233_vm1, %v2323_v58  ;;  %v6137_v58 = vld [vmem:[%s8141_s1 + $0x5c0] sm:$0xff] }
  0xfe   : > { %6573 = vmatprep.subr.msk.mxu1 %vm233_vm1, %v2433_v7 }
  0xff   : > { %6563 = vmatmul.mubr.msk.f32.gmra.mrb[2].mxu1 %vm220_vm0, %v5884_v8  ;;  %6736 = vmatmul.mubr.msk.f32.vlgmr.msra.gmra.mrb[0].mxu0 %vm220_vm0, %v6084_v10  ;;  %v6156_v8 = vld [vmem:[%s8141_s1 + $0x608] sm:$0xff]  ;;  %v6157_v10 = vld [vmem:[%s8141_s1 + $0x610] sm:$0xff] }
 0x100   : > { %6567 = vmatprep.mubr.msk.f32.mxu1 %vm220_vm0, %v5890_v11  ;;  %6738 = vmatprep.mubr.msk.f32.mxu0 %vm220_vm0, %v6085_v12  ;;  %v6158_v11 = vld [vmem:[%s8141_s1 + $0x618] sm:$0xff] }
 0x101   : > { %6742 = vmatpush3.msk.msra.mxu0 %vm233_vm1, %v4747_v63  ;;  %v6140_v63 = vld [vmem:[%s8141_s1 + $0x5d8] sm:$0xff] }
 0x102   : > { %6749 = vmatprep.subr.msk.mxu0 %vm233_vm1, %v4857_v13 }
 0x103   : > { %6568 = vmatmul.mubr.msk.f32.vlgmr.msra.gmra.mrb[0].mxu1 %vm220_vm0, %v5891_v14  ;;  %6739 = vmatmul.mubr.msk.f32.gmra.mrb[2].mxu0 %vm220_vm0, %v6086_v15 }
 0x104   : > { %6570 = vmatprep.mubr.msk.f32.mxu1 %vm220_vm0, %v5892_v16  ;;  %6743 = vmatprep.mubr.msk.f32.mxu0 %vm220_vm0, %v6092_v17 }
 0x105   : > { %6574 = vmatpush3.msk.msra.mxu1 %vm233_vm1, %v2433_v7  ;;  %v6155_v7 = vld [vmem:[%s8141_s1 + $0x600] sm:$0xff] }
 0x106   : > { %6581 = vmatprep.subr.msk.mxu1 %vm233_vm1, %v7121_v3 }
 0x107   : > { %6571 = vmatmul.mubr.msk.f32.gmra.mrb[2].mxu1 %vm220_vm0, %v5893_v18  ;;  %6744 = vmatmul.mubr.msk.f32.vlgmr.msra.gmra.mrb[0].mxu0 %vm220_vm0, %v6093_v19 }
 0x108   : > { %6575 = vmatprep.mubr.msk.f32.mxu1 %vm220_vm0, %v5899_v20  ;;  %6746 = vmatprep.mubr.msk.f32.mxu0 %vm220_vm0, %v6094_v21 }
 0x109   : > { %6750 = vmatpush3.msk.msra.mxu0 %vm233_vm1, %v4857_v13 }
 0x10a   : > { %6757 = vmatprep.subr.msk.mxu0 %vm233_vm1, %v4967_v22 }
 0x10b   : > { %6576 = vmatmul.mubr.msk.f32.vlgmr.msra.gmra.mrb[0].mxu1 %vm220_vm0, %v5900_v23  ;;  %6747 = vmatmul.mubr.msk.f32.gmra.mrb[2].mxu0 %vm220_vm0, %v6095_v24 }
 0x10c   : > { %6578 = vmatprep.mubr.msk.f32.mxu1 %vm220_vm0, %v5901_v25  ;;  %6751 = vmatprep.mubr.msk.f32.mxu0 %vm220_vm0, %v6101_v32 }
 0x10d   : > { %6582 = vmatpush3.msk.msra.mxu1 %vm233_vm1, %v7121_v3  ;;  %v5910_v3 = vld [vmem:[%s8141_s1 + $0x2a8] sm:$0xff] }
 0x10e   : > { %6589 = vmatprep.subr.msk.mxu1 %vm233_vm1, %v7132_v6 }
 0x10f   : > { %6579 = vmatmul.mubr.msk.f32.gmra.mrb[2].mxu1 %vm220_vm0, %v5902_v26  ;;  %6752 = vmatmul.mubr.msk.f32.vlgmr.msra.gmra.mrb[0].mxu0 %vm220_vm0, %v6102_v27 }
 0x110   : > { %6583 = vmatprep.mubr.msk.f32.mxu1 %vm220_vm0, %v5909_v28  ;;  %6754 = vmatprep.mubr.msk.f32.mxu0 %vm220_vm0, %v6103_v30 }
 0x111   : > { %6758 = vmatpush3.msk.msra.mxu0 %vm233_vm1, %v4967_v22 }
 0x112   : > { %6765 = vmatprep.subr.msk.mxu0 %vm233_vm1, %v5077_v29 }
 0x113   : > { %6584 = vmatmul.mubr.msk.f32.vlgmr.msra.gmra.mrb[0].mxu1 %vm220_vm0, %v5910_v3  ;;  %6755 = vmatmul.mubr.msk.f32.gmra.mrb[2].mxu0 %vm220_vm0, %v6104_v36 }
 0x114   : > { %6586 = vmatprep.mubr.msk.f32.mxu1 %vm220_vm0, %v5911_v37  ;;  %6759 = vmatprep.mubr.msk.f32.mxu0 %vm220_vm0, %v6110_v38 }
 0x115   : > { %6590 = vmatpush3.msk.msra.mxu1 %vm233_vm1, %v7132_v6  ;;  %v5920_v6 = vld [vmem:[%s8141_s1 + $0x2c8] sm:$0xff] }
 0x116   : > { %6597 = vmatprep.subr.msk.mxu1 %vm233_vm1, %v7118_v2  ;;  %v5921_v2 = vld [vmem:[%s8141_s1 + $0x2d0] sm:$0xff] }
 0x117   : > { %6587 = vmatmul.mubr.msk.f32.gmra.mrb[2].mxu1 %vm220_vm0, %v5912_v33  ;;  %6760 = vmatmul.mubr.msk.f32.vlgmr.msra.gmra.mrb[0].mxu0 %vm220_vm0, %v6111_v39 }
 0x118   : > { %6591 = vmatprep.mubr.msk.f32.mxu1 %vm220_vm0, %v5919_v40  ;;  %6762 = vmatprep.mubr.msk.f32.mxu0 %vm220_vm0, %v6112_v41 }
 0x119   : > { %6766 = vmatpush3.msk.msra.mxu0 %vm233_vm1, %v5077_v29 }
 0x11a   : > { %6773 = vmatprep.subr.msk.mxu0 %vm233_vm1, %v5187_v42 }
 0x11b   : > { %6592 = vmatmul.mubr.msk.f32.vlgmr.msra.gmra.mrb[0].mxu1 %vm220_vm0, %v5920_v6  ;;  %6763 = vmatmul.mubr.msk.f32.gmra.mrb[2].mxu0 %vm220_vm0, %v6113_v43 }
 0x11c   : > { %6594 = vmatprep.mubr.msk.f32.mxu1 %vm220_vm0, %v5921_v2  ;;  %6767 = vmatprep.mubr.msk.f32.mxu0 %vm220_vm0, %v6119_v31 }
 0x11d   : > { %6598 = vmatpush3.msk.msra.mxu1 %vm233_vm1, %v7033_v46 }
 0x11e   : > { %6805 = vmatprep.subr.msk.mxu1 %vm233_vm1, %v7143_v9  ;;  %v5931_v9 = vld [vmem:[%s8141_s1 + $0x2f0] sm:$0xff] }
 0x11f   : > { %6595 = vmatmul.mubr.msk.f32.gmra.mrb[2].mxu1 %vm220_vm0, %v5922_v44  ;;  %6768 = vmatmul.mubr.msk.f32.vlgmr.msra.gmra.mrb[0].mxu0 %vm220_vm0, %v6120_v45 }
 0x120   : > { %6599 = vmatprep.mubr.msk.f32.mxu1 %vm220_vm0, %v5929_v34  ;;  %6770 = vmatprep.mubr.msk.f32.mxu0 %vm220_vm0, %v6121_v47  ;;  %v203_v18 = vpop.permute.xlu0 %202 }
 0x121   : > { %6774 = vmatpush3.msk.msra.mxu0 %vm233_vm1, %v5187_v42  ;;  %v198_v16 = vpop.permute.xlu1 %197 }
 0x122   : > { %6781 = vmatprep.subr.msk.mxu0 %vm233_vm1, %v5297_v48 }
 0x123   : > { %6771 = vmatmul.mubr.msk.f32.gmra.mrb[2].mxu0 %vm220_vm0, %v6122_v49  ;;  %6600 = vmatmul.mubr.msk.f32.vlgmr.msra.gmra.mrb[0].mxu1 %vm220_vm0, %v5930_v50 }
 0x124   : > { %6602 = vmatprep.mubr.msk.f32.mxu1 %vm220_vm0, %v5931_v9  ;;  %6775 = vmatprep.mubr.msk.f32.mxu0 %vm220_vm0, %v6128_v51 }
 0x125   : > { %6806 = vmatpush3.msk.msra.mxu1 %vm233_vm1, %v7034_v35 }
 0x127   : > { %6603 = vmatmul.mubr.msk.f32.gmra.mrb[2].mxu1 %vm220_vm0, %v5932_v52  ;;  %6776 = vmatmul.mubr.msk.f32.vlgmr.msra.gmra.mrb[0].mxu0 %vm220_vm0, %v6129_v53 }
 0x128   : > { %6778 = vmatprep.mubr.msk.f32.mxu0 %vm220_vm0, %v6130_v54  ;;  %6782 = vmatpush3.msk.msra.mxu0 %vm233_vm1, %v5297_v48 }
 0x129   : > { %6610 = vmatprep.mubr.msk.f32.mxu1 %vm220_vm0, %v5941_v55  ;;  %6789 = vmatprep.subr.msk.mxu0 %vm233_vm1, %v5407_v56  ;;  %v208_v17 = vpop.permute.xlu1 %207 }
 0x12b   : > { %6779 = vmatmul.mubr.msk.f32.gmra.mrb[2].mxu0 %vm220_vm0, %v6131_v57 }
 0x12c   : > { %6783 = vmatprep.mubr.msk.f32.mxu0 %vm220_vm0, %v6137_v58 }
 0x12d   : > { %v213_v21 = vpop.permute.xlu1 %212 }
 0x12f   : > { %6611 = vmatmul.mubr.msk.f32.vlgmr.msra.gmra.mrb[2].mxu1 %vm220_vm0, %v5942_v59  ;;  %6784 = vmatmul.mubr.msk.f32.vlgmr.msra.gmra.mrb[0].mxu0 %vm220_vm0, %v6138_v60 }
 0x130   : > { %6786 = vmatprep.mubr.msk.f32.mxu0 %vm220_vm0, %v6139_v61  ;;  %6790 = vmatpush3.msk.msra.mxu0 %vm233_vm1, %v5407_v56 }
 0x131   : > { %6797 = vmatprep.subr.msk.mxu0 %vm233_vm1, %v5517_v62 }
 0x133   : > { %6787 = vmatmul.mubr.msk.f32.gmra.mrb[2].mxu0 %vm220_vm0, %v6140_v63 }
 0x134   : > { %6791 = vmatprep.mubr.msk.f32.mxu0 %vm220_vm0, %v6146_v0 }
 0x137   : > { %6792 = vmatmul.mubr.msk.f32.vlgmr.msra.gmra.mrb[0].mxu0 %vm220_vm0, %v6147_v1 }
 0x138   : > { %6794 = vmatprep.mubr.msk.f32.mxu0 %vm220_vm0, %v6148_v4  ;;  %6798 = vmatpush3.msk.msra.mxu0 %vm233_vm1, %v5517_v62 }
 0x13b   : > { %6795 = vmatmul.mubr.msk.f32.gmra.mrb[2].mxu0 %vm220_vm0, %v6149_v5 }
 0x13c   : > { %6799 = vmatprep.mubr.msk.f32.mxu0 %vm220_vm0, %v6155_v7 }
 0x13f   : > { %6800 = vmatmul.mubr.msk.f32.vlgmr.msra.gmra.mrb[0].mxu0 %vm220_vm0, %v6156_v8 }
 0x140   : > { %6802 = vmatprep.mubr.msk.f32.mxu0 %vm220_vm0, %v6157_v10 }
 0x143   : > { %6803 = vmatmul.mubr.msk.f32.gmra.mrb[2].mxu0 %vm220_vm0, %v6158_v11 }
 0x1f6   : > { %v6601_v12 = vpop.f32.mrb[0].mxu1 }
 0x1f7   : > { %v2847_v13 = vpop.f32.mrb[1].mxu1  ;;  %v6807_v19 = vadd.f32 %v6601_v12, %v203_v18 }
 0x1f8   : > { %v6809_v20 = vadd.f32 %v2847_v13, %v198_v16 }
 0x202   : > { %v6612_v14 = vpop.f32.mrb[2].mxu1 }
 0x203   : > { %v2968_v15 = vpop.f32.mrb[3].mxu1  ;;  %v6811_v32 = vadd.f32 %v6612_v14, %v213_v21 }
 0x204   : > { %v6813_v26 = vadd.f32 %v2968_v15, %v208_v17 }
 0x212   : > { %v6801_v22 = vpop.f32.mrb[0].mxu0 }
 0x213   : > { %v6808_v23 = vadd.f32 %v6807_v19, %v6801_v22  ;;  %v5598_v24 = vpop.f32.mrb[1].mxu0 }
 0x214   : > { %v6810_v25 = vadd.f32 %v6809_v20, %v5598_v24 }
 0x215   : > { %5623 = vst.msk [vmem:[%s190_s29 + $0x8] sm:$0xff] %vm5621_vm2, %v6808_v23 }
 0x216   : > { %5622 = vst.msk [vmem:[%s190_s29] sm:$0xff] %vm5621_vm2, %v6810_v25  ;;  %v6804_v27 = vpop.f32.mrb[2].mxu0 }
 0x217   : > { %v6812_v28 = vadd.f32 %v6811_v32, %v6804_v27  ;;  %v5608_v30 = vpop.f32.mrb[3].mxu0 }
 0x218   : > { %v6814_v29 = vadd.f32 %v6813_v26, %v5608_v30 }
 0x219   : > { %5625 = vst.msk [vmem:[%s190_s29 + $0x18] sm:$0xff] %vm5621_vm2, %v6812_v28 }
 0x21a   : > { %5624 = vst.msk [vmem:[%s190_s29 + $0x10] sm:$0xff] %vm5621_vm2, %v6814_v29 }
 0x21b PF: > { %s13_s14 = sadd.s32 1, %s7057_s14   ;;  %s8144_s12 = smov %s7053_s13 }
 0x21c   : > { %p10_p5 = scmp.ge.s32.totalorder %s13_s14, 4   ;;  %s8145_s13 = smov %s8147_s15 }
 0x21e   :  { %12 = sbr.rel (!%p10_p5) target bundleno = 2 (0x2), region = 125 }

</bundles_post_ra>
